<compile_context>
chip_gen: v7x
topology: tpu7x:2x2x1
jax: 0.10.0
libtpu: 0.0.40
codegen_flags: <defaults>
</compile_context>

<pallas_src>
import functools

import jax
import jax.numpy as jnp
from jax.experimental import pallas as pl
from jax.experimental.pallas import tpu as pltpu


def _round_up(x, m):
    return ((x + m - 1) // m) * m


# ---------------------------------------------------------------------------
# Kernel
# ---------------------------------------------------------------------------
def _lstm_kernel(ids_ref, w0_ref, b0_ref, whh0_ref, wih1_ref, whh1_ref, b1_ref,
                 wfc_ref, bfc_ref, out_ref, gx0_scr, h0_scr, gx1_scr):
    SB = ids_ref.shape[0]          # S * BP   (time-major, batch-minor rows)
    VP = w0_ref.shape[0]           # padded vocab
    BP = out_ref.shape[0]          # padded batch (multiple of 8 sublanes)
    S = SB // BP                   # timesteps
    G = b0_ref.shape[1]            # 4 * HP (lane-aligned gate width)
    HP = G // 4                    # hidden (32 here, no gate padding needed)

    # --- fused embedding gather + folded layer-0 input projection ----------
    # gx0 = one_hot(ids) @ (emb @ W_ih0) + b0   (single MXU pass)
    ids = ids_ref[...]                                                 # (SB, 1)
    onehot = (ids == jax.lax.broadcasted_iota(jnp.int32, (SB, VP), 1)
              ).astype(jnp.float32)                                    # (SB, VP)
    gx0_scr[...] = (jnp.dot(onehot, w0_ref[...],
                            preferred_element_type=jnp.float32)
                    + b0_ref[...])                                     # (SB, G)

    def sigmoid(z):                      # single EUP tanh push (no divide)
        return 0.5 * jnp.tanh(0.5 * z) + 0.5

    def cell(h, c, gates):
        i = sigmoid(gates[:, 0 * HP:1 * HP])
        f = sigmoid(gates[:, 1 * HP:2 * HP])
        g = jnp.tanh(gates[:, 2 * HP:3 * HP])
        o = sigmoid(gates[:, 3 * HP:4 * HP])
        c_new = f * c + i * g
        h_new = o * jnp.tanh(c_new)
        return h_new, c_new

    z = jnp.zeros((BP, HP), jnp.float32)

    # --- pass 1: layer-0 recurrence only; stash h0_t in VMEM ---------------
    def step0(t, carry):
        h0, c0 = carry
        row = pl.multiple_of(t * BP, BP)
        g0 = (gx0_scr[pl.ds(row, BP), :]
              + jnp.dot(h0, whh0_ref[...], preferred_element_type=jnp.float32))
        h0, c0 = cell(h0, c0, g0)
        h0_scr[pl.ds(row, BP), :] = h0
        return (h0, c0)

    jax.lax.fori_loop(0, S, step0, (z, z), unroll=True)

    # --- layer-1 input projections for ALL timesteps in one big matmul -----
    gx1_scr[...] = (jnp.dot(h0_scr[...], wih1_ref[...],
                            preferred_element_type=jnp.float32)
                    + b1_ref[...])                                     # (SB, G)

    # --- pass 2: layer-1 recurrence only ------------------------------------
    def step1(t, carry):
        h1, c1 = carry
        row = pl.multiple_of(t * BP, BP)
        g1 = (gx1_scr[pl.ds(row, BP), :]
              + jnp.dot(h1, whh1_ref[...], preferred_element_type=jnp.float32))
        return cell(h1, c1, g1)

    h1, _ = jax.lax.fori_loop(0, S, step1, (z, z), unroll=True)

    # Lane-dense (BP, 128) store -> unmasked vst; real classes are cols [:4].
    out_ref[...] = (jnp.dot(h1, wfc_ref[...],
                            preferred_element_type=jnp.float32)
                    + bfc_ref[...])


# ---------------------------------------------------------------------------
# Padding helpers (zero padding keeps the math exact; run ONCE outside jit)
# ---------------------------------------------------------------------------
def _pad_matrix(x, rows, cols):
    return jnp.pad(x, ((0, rows - x.shape[0]), (0, cols - x.shape[1])))


def _pad_gate_cols(w, rows_p, hid, hid_p):
    """(in, 4*hid) -> (rows_p, 4*hid_p): each gate block zero-padded separately."""
    r = w.shape[0]
    blocks = [jnp.pad(w[:, k * hid:(k + 1) * hid],
                      ((0, rows_p - r), (0, hid_p - hid))) for k in range(4)]
    return jnp.concatenate(blocks, axis=1)


def prepare_params(embeddings, params, *, hid, num_classes):
    """Pad/fold weights once; amortized across forward calls."""
    wih0, whh0, b0, wih1, whh1, b1, wfc, bfc = params
    V, _ = embeddings.shape
    HP = _round_up(hid, 32)          # 4*HP is a multiple of 128 (lane-aligned)
    VP = _round_up(V, 128)
    CP = _round_up(num_classes, 128)

    # Fold embedding table into the layer-0 input projection (exact up to
    # f32 reassociation): W0' = emb @ W_ih0
    w0 = embeddings.astype(jnp.float32) @ wih0            # (V, 4*hid)

    w0p = _pad_gate_cols(w0, VP, hid, HP)
    b0p = _pad_gate_cols(b0, 1, hid, HP)
    whh0p = _pad_gate_cols(whh0, HP, hid, HP)
    wih1p = _pad_gate_cols(wih1, HP, hid, HP)
    whh1p = _pad_gate_cols(whh1, HP, hid, HP)
    b1p = _pad_gate_cols(b1, 1, hid, HP)
    wfcp = _pad_matrix(wfc, HP, CP)
    bfcp = _pad_matrix(bfc, 1, CP)
    return (w0p, b0p, whh0p, wih1p, whh1p, b1p, wfcp, bfcp)


# ---------------------------------------------------------------------------
# Forward wrapper (per-call path: build id column + one pallas_call)
# ---------------------------------------------------------------------------
@functools.partial(jax.jit, static_argnames=("num_classes",))
def recurrent_network_forward(token_ids, padded_params, *, num_classes):
    w0p, b0p, whh0p, wih1p, whh1p, b1p, wfcp, bfcp = padded_params
    B, S = token_ids.shape
    VP, G = w0p.shape
    HP = G // 4
    CP = wfcp.shape[1]
    BP = _round_up(B, 8)
    SB = S * BP

    # Time-major (t-major, b-minor) token-id column; padded batch rows use id 0.
    ids_pad = jnp.zeros((BP, S), jnp.int32).at[:B, :].set(token_ids.astype(jnp.int32))
    ids_col = ids_pad.T.reshape(SB, 1)

    flops = 2 * (SB * VP * G            # onehot @ W0'
                 + S * BP * HP * G      # layer-0 recurrent dots
                 + SB * HP * G          # layer-1 input projection (one matmul)
                 + S * BP * HP * G      # layer-1 recurrent dots
                 + BP * HP * CP)        # fc
    transcendentals = 2 * S * 5 * BP * HP
    bytes_accessed = 4 * (SB + VP * G + 4 * HP * G + 2 * G
                          + HP * CP + CP + BP * CP)

    vmem = pl.BlockSpec(memory_space=pltpu.MemorySpace.VMEM)
    out_p = pl.pallas_call(
        _lstm_kernel,
        out_shape=jax.ShapeDtypeStruct((BP, CP), jnp.float32),
        in_specs=[vmem] * 9,
        out_specs=vmem,
        scratch_shapes=[pltpu.VMEM((SB, G), jnp.float32),    # gx0 (all t)
                        pltpu.VMEM((SB, HP), jnp.float32),   # h0  (all t)
                        pltpu.VMEM((SB, G), jnp.float32)],   # gx1 (all t)
        cost_estimate=pl.CostEstimate(flops=flops,
                                      transcendentals=transcendentals,
                                      bytes_accessed=bytes_accessed),
    )(ids_col, w0p, b0p, whh0p, wih1p, whh1p, b1p, wfcp, bfcp)

    return out_p[:B, :num_classes]


# ---------------------------------------------------------------------------
# Parameter init (mirrors the module: xavier LSTM weights, zero LSTM biases)
# ---------------------------------------------------------------------------
def init_params(key, vocab, emb, hid, ncls):
    ks = jax.random.split(key, 6)

    def xavier(k, shape):
        std = (2.0 / (shape[0] + shape[1])) ** 0.5
        return std * jax.random.normal(k, shape, jnp.float32)

    wih0 = xavier(ks[0], (emb, 4 * hid))
    whh0 = xavier(ks[1], (hid, 4 * hid))
    wih1 = xavier(ks[2], (hid, 4 * hid))
    whh1 = xavier(ks[3], (hid, 4 * hid))
    b0 = jnp.zeros((1, 4 * hid), jnp.float32)   # LSTM biases zero-initialized
    b1 = jnp.zeros((1, 4 * hid), jnp.float32)
    wfc = xavier(ks[4], (hid, ncls))
    bfc = 0.01 * jax.random.normal(ks[5], (1, ncls), jnp.float32)
    return (wih0, whh0, b0, wih1, whh1, b1, wfc, bfc)


# ---------------------------------------------------------------------------
# Pure-JAX reference (matches the PyTorch module semantics)
# ---------------------------------------------------------------------------
def reference_forward(token_ids, embeddings, params, *, hid, num_classes):
    wih0, whh0, b0, wih1, whh1, b1, wfc, bfc = params
    B, S = token_ids.shape
    H = hid
    x = jnp.take(embeddings, token_ids, axis=0).astype(jnp.float32)  # (B, S, E)

    def sigmoid(z):
        return 1.0 / (1.0 + jnp.exp(-z))

    def cell(h, c, gates):
        i = sigmoid(gates[:, 0 * H:1 * H])
        f = sigmoid(gates[:, 1 * H:2 * H])
        g = jnp.tanh(gates[:, 2 * H:3 * H])
        o = sigmoid(gates[:, 3 * H:4 * H])
        c = f * c + i * g
        h = o * jnp.tanh(c)
        return h, c

    h0 = c0 = h1 = c1 = jnp.zeros((B, H), jnp.float32)
    for t in range(S):
        xt = x[:, t, :]
        h0, c0 = cell(h0, c0, xt @ wih0 + h0 @ whh0 + b0)
        h1, c1 = cell(h1, c1, h0 @ wih1 + h1 @ whh1 + b1)
    return h1 @ wfc + bfc                                            # y[-1] @ W_fc + b


if __name__ == "__main__":
    key = jax.random.PRNGKey(0)
    k_emb, k_tok, k_par = jax.random.split(key, 3)

    VOCAB, EMB, HID, NCLS = 50, 100, 32, 4
    B, S = 2, 8

    embeddings = jax.random.normal(k_emb, (VOCAB, EMB), jnp.float32)
    token_ids = jax.random.randint(k_tok, (B, S), 0, VOCAB, jnp.int32)
    params = init_params(k_par, VOCAB, EMB, HID, NCLS)

    padded_params = prepare_params(embeddings, params, hid=HID, num_classes=NCLS)
    padded_params = jax.tree_util.tree_map(jax.block_until_ready, padded_params)

    out = recurrent_network_forward(token_ids, padded_params, num_classes=NCLS)
    out = jax.block_until_ready(out)

    ref = reference_forward(token_ids, embeddings, params,
                            hid=HID, num_classes=NCLS)
    assert out.shape == (B, NCLS)
    assert jnp.allclose(out, ref, atol=1e-4, rtol=1e-4), (out, ref)

    print("KERNEL_OK")
</pallas_src>

<mosaic_0001>
module attributes {stable_mosaic.version = 11 : i64} {
  func.func @_lstm_kernel(%arg0: memref<64x1xi32, #tpu.memory_space<vmem>>, %arg1: memref<128x128xf32, #tpu.memory_space<vmem>>, %arg2: memref<1x128xf32, #tpu.memory_space<vmem>>, %arg3: memref<32x128xf32, #tpu.memory_space<vmem>>, %arg4: memref<32x128xf32, #tpu.memory_space<vmem>>, %arg5: memref<32x128xf32, #tpu.memory_space<vmem>>, %arg6: memref<1x128xf32, #tpu.memory_space<vmem>>, %arg7: memref<32x128xf32, #tpu.memory_space<vmem>>, %arg8: memref<1x128xf32, #tpu.memory_space<vmem>>, %arg9: memref<8x128xf32, #tpu.memory_space<vmem>>, %arg10: memref<64x128xf32, #tpu.memory_space<vmem>>, %arg11: memref<64x32xf32, #tpu.memory_space<vmem>>, %arg12: memref<64x128xf32, #tpu.memory_space<vmem>>) attributes {dimension_semantics = [], scalar_prefetch = 0 : i64, scratch_operands = 3 : i64, tpu.core_type = #tpu.core_type<tc>} {
    %c0 = arith.constant 0 : index
    %c0_0 = arith.constant 0 : index
    %0 = vector.load %arg0[%c0, %c0_0] : memref<64x1xi32, #tpu.memory_space<vmem>>, vector<64x1xi32>
    %1 = tpu.iota {dimensions = array<i32: 1>} : vector<64x128xi32>
    %2 = vector.broadcast %0 : vector<64x1xi32> to vector<64x128xi32>
    %3 = arith.cmpi eq, %2, %1 : vector<64x128xi32>
    %4 = arith.extui %3 : vector<64x128xi1> to vector<64x128xi32>
    %5 = arith.sitofp %4 : vector<64x128xi32> to vector<64x128xf32>
    %c0_1 = arith.constant 0 : index
    %c0_2 = arith.constant 0 : index
    %6 = vector.load %arg1[%c0_1, %c0_2] : memref<128x128xf32, #tpu.memory_space<vmem>>, vector<128x128xf32>
    %cst = arith.constant dense<0.000000e+00> : vector<64x128xf32>
    %7 = tpu.matmul %5, %6, %cst {dimension_numbers = #tpu.dot_dimension_numbers<[1], [0], [0], [1], [0, 0, 1, 1], [], []>} : vector<64x128xf32>, vector<128x128xf32>, vector<64x128xf32> -> vector<64x128xf32>
    %c0_3 = arith.constant 0 : index
    %c0_4 = arith.constant 0 : index
    %8 = vector.load %arg2[%c0_3, %c0_4] : memref<1x128xf32, #tpu.memory_space<vmem>>, vector<1x128xf32>
    %9 = vector.broadcast %8 : vector<1x128xf32> to vector<64x128xf32>
    %10 = arith.addf %7, %9 : vector<64x128xf32>
    %c0_5 = arith.constant 0 : index
    %c0_6 = arith.constant 0 : index
    %11 = vector.load %arg10[%c0_5, %c0_6] : memref<64x128xf32, #tpu.memory_space<vmem>>, vector<64x128xf32>
    tpu.vector_store %arg10[%c0_5, %c0_6], %10 {strides = array<i32>} : memref<64x128xf32, #tpu.memory_space<vmem>>, vector<64x128xf32>,
    %cst_7 = arith.constant 0.000000e+00 : f32
    %12 = vector.broadcast %cst_7 : f32 to vector<8x32xf32>
    %c0_i32 = arith.constant 0 : i32
    %c8_i32 = arith.constant 8 : i32
    %13 = arith.muli %c0_i32, %c8_i32 : i32
    %14 = tpu.assume_multiple %13, 8 : i32
    %15 = arith.index_cast %14 : i32 to index
    %c0_8 = arith.constant 0 : index
    %16 = vector.load %arg10[%15, %c0_8] : memref<64x128xf32, #tpu.memory_space<vmem>>, vector<8x128xf32>
    %c0_9 = arith.constant 0 : index
    %c0_10 = arith.constant 0 : index
    %17 = vector.load %arg3[%c0_9, %c0_10] : memref<32x128xf32, #tpu.memory_space<vmem>>, vector<32x128xf32>
    %cst_11 = arith.constant dense<0.000000e+00> : vector<8x128xf32>
    %18 = tpu.matmul %12, %17, %cst_11 {dimension_numbers = #tpu.dot_dimension_numbers<[1], [0], [0], [1], [0, 0, 1, 1], [], []>} : vector<8x32xf32>, vector<32x128xf32>, vector<8x128xf32> -> vector<8x128xf32>
    %19 = arith.addf %16, %18 : vector<8x128xf32>
    %20 = vector.extract_strided_slice %19 {offsets = [0, 0], sizes = [8, 32], strides = [1, 1]} : vector<8x128xf32> to vector<8x32xf32>
    %cst_12 = arith.constant 5.000000e-01 : f32
    %21 = vector.broadcast %cst_12 : f32 to vector<8x32xf32>
    %22 = arith.mulf %21, %20 : vector<8x32xf32>
    %23 = math.tanh %22 : vector<8x32xf32>
    %cst_13 = arith.constant 5.000000e-01 : f32
    %24 = vector.broadcast %cst_13 : f32 to vector<8x32xf32>
    %25 = arith.mulf %24, %23 : vector<8x32xf32>
    %cst_14 = arith.constant 5.000000e-01 : f32
    %26 = vector.broadcast %cst_14 : f32 to vector<8x32xf32>
    %27 = arith.addf %25, %26 : vector<8x32xf32>
    %28 = vector.extract_strided_slice %19 {offsets = [0, 32], sizes = [8, 32], strides = [1, 1]} : vector<8x128xf32> to vector<8x32xf32>
    %cst_15 = arith.constant 5.000000e-01 : f32
    %29 = vector.broadcast %cst_15 : f32 to vector<8x32xf32>
    %30 = arith.mulf %29, %28 : vector<8x32xf32>
    %31 = math.tanh %30 : vector<8x32xf32>
    %cst_16 = arith.constant 5.000000e-01 : f32
    %32 = vector.broadcast %cst_16 : f32 to vector<8x32xf32>
    %33 = arith.mulf %32, %31 : vector<8x32xf32>
    %cst_17 = arith.constant 5.000000e-01 : f32
    %34 = vector.broadcast %cst_17 : f32 to vector<8x32xf32>
    %35 = arith.addf %33, %34 : vector<8x32xf32>
    %36 = vector.extract_strided_slice %19 {offsets = [0, 64], sizes = [8, 32], strides = [1, 1]} : vector<8x128xf32> to vector<8x32xf32>
    %37 = math.tanh %36 : vector<8x32xf32>
    %38 = vector.extract_strided_slice %19 {offsets = [0, 96], sizes = [8, 32], strides = [1, 1]} : vector<8x128xf32> to vector<8x32xf32>
    %cst_18 = arith.constant 5.000000e-01 : f32
    %39 = vector.broadcast %cst_18 : f32 to vector<8x32xf32>
    %40 = arith.mulf %39, %38 : vector<8x32xf32>
    %41 = math.tanh %40 : vector<8x32xf32>
    %cst_19 = arith.constant 5.000000e-01 : f32
    %42 = vector.broadcast %cst_19 : f32 to vector<8x32xf32>
    %43 = arith.mulf %42, %41 : vector<8x32xf32>
    %cst_20 = arith.constant 5.000000e-01 : f32
    %44 = vector.broadcast %cst_20 : f32 to vector<8x32xf32>
    %45 = arith.addf %43, %44 : vector<8x32xf32>
    %46 = arith.mulf %35, %12 : vector<8x32xf32>
    %47 = arith.mulf %27, %37 : vector<8x32xf32>
    %48 = arith.addf %46, %47 : vector<8x32xf32>
    %49 = math.tanh %48 : vector<8x32xf32>
    %50 = arith.mulf %45, %49 : vector<8x32xf32>
    %51 = arith.index_cast %14 : i32 to index
    %c0_21 = arith.constant 0 : index
    %52 = vector.load %arg11[%51, %c0_21] : memref<64x32xf32, #tpu.memory_space<vmem>>, vector<8x32xf32>
    tpu.vector_store %arg11[%51, %c0_21], %50 {strides = array<i32>} : memref<64x32xf32, #tpu.memory_space<vmem>>, vector<8x32xf32>,
    %c1_i32 = arith.constant 1 : i32
    %c8_i32_22 = arith.constant 8 : i32
    %53 = arith.muli %c1_i32, %c8_i32_22 : i32
    %54 = tpu.assume_multiple %53, 8 : i32
    %55 = arith.index_cast %54 : i32 to index
    %c0_23 = arith.constant 0 : index
    %56 = vector.load %arg10[%55, %c0_23] : memref<64x128xf32, #tpu.memory_space<vmem>>, vector<8x128xf32>
    %c0_24 = arith.constant 0 : index
    %c0_25 = arith.constant 0 : index
    %57 = vector.load %arg3[%c0_24, %c0_25] : memref<32x128xf32, #tpu.memory_space<vmem>>, vector<32x128xf32>
    %cst_26 = arith.constant dense<0.000000e+00> : vector<8x128xf32>
    %58 = tpu.matmul %50, %57, %cst_26 {dimension_numbers = #tpu.dot_dimension_numbers<[1], [0], [0], [1], [0, 0, 1, 1], [], []>} : vector<8x32xf32>, vector<32x128xf32>, vector<8x128xf32> -> vector<8x128xf32>
    %59 = arith.addf %56, %58 : vector<8x128xf32>
    %60 = vector.extract_strided_slice %59 {offsets = [0, 0], sizes = [8, 32], strides = [1, 1]} : vector<8x128xf32> to vector<8x32xf32>
    %cst_27 = arith.constant 5.000000e-01 : f32
    %61 = vector.broadcast %cst_27 : f32 to vector<8x32xf32>
    %62 = arith.mulf %61, %60 : vector<8x32xf32>
    %63 = math.tanh %62 : vector<8x32xf32>
    %cst_28 = arith.constant 5.000000e-01 : f32
    %64 = vector.broadcast %cst_28 : f32 to vector<8x32xf32>
    %65 = arith.mulf %64, %63 : vector<8x32xf32>
    %cst_29 = arith.constant 5.000000e-01 : f32
    %66 = vector.broadcast %cst_29 : f32 to vector<8x32xf32>
    %67 = arith.addf %65, %66 : vector<8x32xf32>
    %68 = vector.extract_strided_slice %59 {offsets = [0, 32], sizes = [8, 32], strides = [1, 1]} : vector<8x128xf32> to vector<8x32xf32>
    %cst_30 = arith.constant 5.000000e-01 : f32
    %69 = vector.broadcast %cst_30 : f32 to vector<8x32xf32>
    %70 = arith.mulf %69, %68 : vector<8x32xf32>
    %71 = math.tanh %70 : vector<8x32xf32>
    %cst_31 = arith.constant 5.000000e-01 : f32
    %72 = vector.broadcast %cst_31 : f32 to vector<8x32xf32>
    %73 = arith.mulf %72, %71 : vector<8x32xf32>
    %cst_32 = arith.constant 5.000000e-01 : f32
    %74 = vector.broadcast %cst_32 : f32 to vector<8x32xf32>
    %75 = arith.addf %73, %74 : vector<8x32xf32>
    %76 = vector.extract_strided_slice %59 {offsets = [0, 64], sizes = [8, 32], strides = [1, 1]} : vector<8x128xf32> to vector<8x32xf32>
    %77 = math.tanh %76 : vector<8x32xf32>
    %78 = vector.extract_strided_slice %59 {offsets = [0, 96], sizes = [8, 32], strides = [1, 1]} : vector<8x128xf32> to vector<8x32xf32>
    %cst_33 = arith.constant 5.000000e-01 : f32
    %79 = vector.broadcast %cst_33 : f32 to vector<8x32xf32>
    %80 = arith.mulf %79, %78 : vector<8x32xf32>
    %81 = math.tanh %80 : vector<8x32xf32>
    %cst_34 = arith.constant 5.000000e-01 : f32
    %82 = vector.broadcast %cst_34 : f32 to vector<8x32xf32>
    %83 = arith.mulf %82, %81 : vector<8x32xf32>
    %cst_35 = arith.constant 5.000000e-01 : f32
    %84 = vector.broadcast %cst_35 : f32 to vector<8x32xf32>
    %85 = arith.addf %83, %84 : vector<8x32xf32>
    %86 = arith.mulf %75, %48 : vector<8x32xf32>
    %87 = arith.mulf %67, %77 : vector<8x32xf32>
    %88 = arith.addf %86, %87 : vector<8x32xf32>
    %89 = math.tanh %88 : vector<8x32xf32>
    %90 = arith.mulf %85, %89 : vector<8x32xf32>
    %91 = arith.index_cast %54 : i32 to index
    %c0_36 = arith.constant 0 : index
    %92 = vector.load %arg11[%91, %c0_36] : memref<64x32xf32, #tpu.memory_space<vmem>>, vector<8x32xf32>
    tpu.vector_store %arg11[%91, %c0_36], %90 {strides = array<i32>} : memref<64x32xf32, #tpu.memory_space<vmem>>, vector<8x32xf32>,
    %c2_i32 = arith.constant 2 : i32
    %c8_i32_37 = arith.constant 8 : i32
    %93 = arith.muli %c2_i32, %c8_i32_37 : i32
    %94 = tpu.assume_multiple %93, 8 : i32
    %95 = arith.index_cast %94 : i32 to index
    %c0_38 = arith.constant 0 : index
    %96 = vector.load %arg10[%95, %c0_38] : memref<64x128xf32, #tpu.memory_space<vmem>>, vector<8x128xf32>
    %c0_39 = arith.constant 0 : index
    %c0_40 = arith.constant 0 : index
    %97 = vector.load %arg3[%c0_39, %c0_40] : memref<32x128xf32, #tpu.memory_space<vmem>>, vector<32x128xf32>
    %cst_41 = arith.constant dense<0.000000e+00> : vector<8x128xf32>
    %98 = tpu.matmul %90, %97, %cst_41 {dimension_numbers = #tpu.dot_dimension_numbers<[1], [0], [0], [1], [0, 0, 1, 1], [], []>} : vector<8x32xf32>, vector<32x128xf32>, vector<8x128xf32> -> vector<8x128xf32>
    %99 = arith.addf %96, %98 : vector<8x128xf32>
    %100 = vector.extract_strided_slice %99 {offsets = [0, 0], sizes = [8, 32], strides = [1, 1]} : vector<8x128xf32> to vector<8x32xf32>
    %cst_42 = arith.constant 5.000000e-01 : f32
    %101 = vector.broadcast %cst_42 : f32 to vector<8x32xf32>
    %102 = arith.mulf %101, %100 : vector<8x32xf32>
    %103 = math.tanh %102 : vector<8x32xf32>
    %cst_43 = arith.constant 5.000000e-01 : f32
    %104 = vector.broadcast %cst_43 : f32 to vector<8x32xf32>
    %105 = arith.mulf %104, %103 : vector<8x32xf32>
    %cst_44 = arith.constant 5.000000e-01 : f32
    %106 = vector.broadcast %cst_44 : f32 to vector<8x32xf32>
    %107 = arith.addf %105, %106 : vector<8x32xf32>
    %108 = vector.extract_strided_slice %99 {offsets = [0, 32], sizes = [8, 32], strides = [1, 1]} : vector<8x128xf32> to vector<8x32xf32>
    %cst_45 = arith.constant 5.000000e-01 : f32
    %109 = vector.broadcast %cst_45 : f32 to vector<8x32xf32>
    %110 = arith.mulf %109, %108 : vector<8x32xf32>
    %111 = math.tanh %110 : vector<8x32xf32>
    %cst_46 = arith.constant 5.000000e-01 : f32
    %112 = vector.broadcast %cst_46 : f32 to vector<8x32xf32>
    %113 = arith.mulf %112, %111 : vector<8x32xf32>
    %cst_47 = arith.constant 5.000000e-01 : f32
    %114 = vector.broadcast %cst_47 : f32 to vector<8x32xf32>
    %115 = arith.addf %113, %114 : vector<8x32xf32>
    %116 = vector.extract_strided_slice %99 {offsets = [0, 64], sizes = [8, 32], strides = [1, 1]} : vector<8x128xf32> to vector<8x32xf32>
    %117 = math.tanh %116 : vector<8x32xf32>
    %118 = vector.extract_strided_slice %99 {offsets = [0, 96], sizes = [8, 32], strides = [1, 1]} : vector<8x128xf32> to vector<8x32xf32>
    %cst_48 = arith.constant 5.000000e-01 : f32
    %119 = vector.broadcast %cst_48 : f32 to vector<8x32xf32>
    %120 = arith.mulf %119, %118 : vector<8x32xf32>
    %121 = math.tanh %120 : vector<8x32xf32>
    %cst_49 = arith.constant 5.000000e-01 : f32
    %122 = vector.broadcast %cst_49 : f32 to vector<8x32xf32>
    %123 = arith.mulf %122, %121 : vector<8x32xf32>
    %cst_50 = arith.constant 5.000000e-01 : f32
    %124 = vector.broadcast %cst_50 : f32 to vector<8x32xf32>
    %125 = arith.addf %123, %124 : vector<8x32xf32>
    %126 = arith.mulf %115, %88 : vector<8x32xf32>
    %127 = arith.mulf %107, %117 : vector<8x32xf32>
    %128 = arith.addf %126, %127 : vector<8x32xf32>
    %129 = math.tanh %128 : vector<8x32xf32>
    %130 = arith.mulf %125, %129 : vector<8x32xf32>
    %131 = arith.index_cast %94 : i32 to index
    %c0_51 = arith.constant 0 : index
    %132 = vector.load %arg11[%131, %c0_51] : memref<64x32xf32, #tpu.memory_space<vmem>>, vector<8x32xf32>
    tpu.vector_store %arg11[%131, %c0_51], %130 {strides = array<i32>} : memref<64x32xf32, #tpu.memory_space<vmem>>, vector<8x32xf32>,
    %c3_i32 = arith.constant 3 : i32
    %c8_i32_52 = arith.constant 8 : i32
    %133 = arith.muli %c3_i32, %c8_i32_52 : i32
    %134 = tpu.assume_multiple %133, 8 : i32
    %135 = arith.index_cast %134 : i32 to index
    %c0_53 = arith.constant 0 : index
    %136 = vector.load %arg10[%135, %c0_53] : memref<64x128xf32, #tpu.memory_space<vmem>>, vector<8x128xf32>
    %c0_54 = arith.constant 0 : index
    %c0_55 = arith.constant 0 : index
    %137 = vector.load %arg3[%c0_54, %c0_55] : memref<32x128xf32, #tpu.memory_space<vmem>>, vector<32x128xf32>
    %cst_56 = arith.constant dense<0.000000e+00> : vector<8x128xf32>
    %138 = tpu.matmul %130, %137, %cst_56 {dimension_numbers = #tpu.dot_dimension_numbers<[1], [0], [0], [1], [0, 0, 1, 1], [], []>} : vector<8x32xf32>, vector<32x128xf32>, vector<8x128xf32> -> vector<8x128xf32>
    %139 = arith.addf %136, %138 : vector<8x128xf32>
    %140 = vector.extract_strided_slice %139 {offsets = [0, 0], sizes = [8, 32], strides = [1, 1]} : vector<8x128xf32> to vector<8x32xf32>
    %cst_57 = arith.constant 5.000000e-01 : f32
    %141 = vector.broadcast %cst_57 : f32 to vector<8x32xf32>
    %142 = arith.mulf %141, %140 : vector<8x32xf32>
    %143 = math.tanh %142 : vector<8x32xf32>
    %cst_58 = arith.constant 5.000000e-01 : f32
    %144 = vector.broadcast %cst_58 : f32 to vector<8x32xf32>
    %145 = arith.mulf %144, %143 : vector<8x32xf32>
    %cst_59 = arith.constant 5.000000e-01 : f32
    %146 = vector.broadcast %cst_59 : f32 to vector<8x32xf32>
    %147 = arith.addf %145, %146 : vector<8x32xf32>
    %148 = vector.extract_strided_slice %139 {offsets = [0, 32], sizes = [8, 32], strides = [1, 1]} : vector<8x128xf32> to vector<8x32xf32>
    %cst_60 = arith.constant 5.000000e-01 : f32
    %149 = vector.broadcast %cst_60 : f32 to vector<8x32xf32>
    %150 = arith.mulf %149, %148 : vector<8x32xf32>
    %151 = math.tanh %150 : vector<8x32xf32>
    %cst_61 = arith.constant 5.000000e-01 : f32
    %152 = vector.broadcast %cst_61 : f32 to vector<8x32xf32>
    %153 = arith.mulf %152, %151 : vector<8x32xf32>
    %cst_62 = arith.constant 5.000000e-01 : f32
    %154 = vector.broadcast %cst_62 : f32 to vector<8x32xf32>
    %155 = arith.addf %153, %154 : vector<8x32xf32>
    %156 = vector.extract_strided_slice %139 {offsets = [0, 64], sizes = [8, 32], strides = [1, 1]} : vector<8x128xf32> to vector<8x32xf32>
    %157 = math.tanh %156 : vector<8x32xf32>
    %158 = vector.extract_strided_slice %139 {offsets = [0, 96], sizes = [8, 32], strides = [1, 1]} : vector<8x128xf32> to vector<8x32xf32>
    %cst_63 = arith.constant 5.000000e-01 : f32
    %159 = vector.broadcast %cst_63 : f32 to vector<8x32xf32>
    %160 = arith.mulf %159, %158 : vector<8x32xf32>
    %161 = math.tanh %160 : vector<8x32xf32>
    %cst_64 = arith.constant 5.000000e-01 : f32
    %162 = vector.broadcast %cst_64 : f32 to vector<8x32xf32>
    %163 = arith.mulf %162, %161 : vector<8x32xf32>
    %cst_65 = arith.constant 5.000000e-01 : f32
    %164 = vector.broadcast %cst_65 : f32 to vector<8x32xf32>
    %165 = arith.addf %163, %164 : vector<8x32xf32>
    %166 = arith.mulf %155, %128 : vector<8x32xf32>
    %167 = arith.mulf %147, %157 : vector<8x32xf32>
    %168 = arith.addf %166, %167 : vector<8x32xf32>
    %169 = math.tanh %168 : vector<8x32xf32>
    %170 = arith.mulf %165, %169 : vector<8x32xf32>
    %171 = arith.index_cast %134 : i32 to index
    %c0_66 = arith.constant 0 : index
    %172 = vector.load %arg11[%171, %c0_66] : memref<64x32xf32, #tpu.memory_space<vmem>>, vector<8x32xf32>
    tpu.vector_store %arg11[%171, %c0_66], %170 {strides = array<i32>} : memref<64x32xf32, #tpu.memory_space<vmem>>, vector<8x32xf32>,
    %c4_i32 = arith.constant 4 : i32
    %c8_i32_67 = arith.constant 8 : i32
    %173 = arith.muli %c4_i32, %c8_i32_67 : i32
    %174 = tpu.assume_multiple %173, 8 : i32
    %175 = arith.index_cast %174 : i32 to index
    %c0_68 = arith.constant 0 : index
    %176 = vector.load %arg10[%175, %c0_68] : memref<64x128xf32, #tpu.memory_space<vmem>>, vector<8x128xf32>
    %c0_69 = arith.constant 0 : index
    %c0_70 = arith.constant 0 : index
    %177 = vector.load %arg3[%c0_69, %c0_70] : memref<32x128xf32, #tpu.memory_space<vmem>>, vector<32x128xf32>
    %cst_71 = arith.constant dense<0.000000e+00> : vector<8x128xf32>
    %178 = tpu.matmul %170, %177, %cst_71 {dimension_numbers = #tpu.dot_dimension_numbers<[1], [0], [0], [1], [0, 0, 1, 1], [], []>} : vector<8x32xf32>, vector<32x128xf32>, vector<8x128xf32> -> vector<8x128xf32>
    %179 = arith.addf %176, %178 : vector<8x128xf32>
    %180 = vector.extract_strided_slice %179 {offsets = [0, 0], sizes = [8, 32], strides = [1, 1]} : vector<8x128xf32> to vector<8x32xf32>
    %cst_72 = arith.constant 5.000000e-01 : f32
    %181 = vector.broadcast %cst_72 : f32 to vector<8x32xf32>
    %182 = arith.mulf %181, %180 : vector<8x32xf32>
    %183 = math.tanh %182 : vector<8x32xf32>
    %cst_73 = arith.constant 5.000000e-01 : f32
    %184 = vector.broadcast %cst_73 : f32 to vector<8x32xf32>
    %185 = arith.mulf %184, %183 : vector<8x32xf32>
    %cst_74 = arith.constant 5.000000e-01 : f32
    %186 = vector.broadcast %cst_74 : f32 to vector<8x32xf32>
    %187 = arith.addf %185, %186 : vector<8x32xf32>
    %188 = vector.extract_strided_slice %179 {offsets = [0, 32], sizes = [8, 32], strides = [1, 1]} : vector<8x128xf32> to vector<8x32xf32>
    %cst_75 = arith.constant 5.000000e-01 : f32
    %189 = vector.broadcast %cst_75 : f32 to vector<8x32xf32>
    %190 = arith.mulf %189, %188 : vector<8x32xf32>
    %191 = math.tanh %190 : vector<8x32xf32>
    %cst_76 = arith.constant 5.000000e-01 : f32
    %192 = vector.broadcast %cst_76 : f32 to vector<8x32xf32>
    %193 = arith.mulf %192, %191 : vector<8x32xf32>
    %cst_77 = arith.constant 5.000000e-01 : f32
    %194 = vector.broadcast %cst_77 : f32 to vector<8x32xf32>
    %195 = arith.addf %193, %194 : vector<8x32xf32>
    %196 = vector.extract_strided_slice %179 {offsets = [0, 64], sizes = [8, 32], strides = [1, 1]} : vector<8x128xf32> to vector<8x32xf32>
    %197 = math.tanh %196 : vector<8x32xf32>
    %198 = vector.extract_strided_slice %179 {offsets = [0, 96], sizes = [8, 32], strides = [1, 1]} : vector<8x128xf32> to vector<8x32xf32>
    %cst_78 = arith.constant 5.000000e-01 : f32
    %199 = vector.broadcast %cst_78 : f32 to vector<8x32xf32>
    %200 = arith.mulf %199, %198 : vector<8x32xf32>
    %201 = math.tanh %200 : vector<8x32xf32>
    %cst_79 = arith.constant 5.000000e-01 : f32
    %202 = vector.broadcast %cst_79 : f32 to vector<8x32xf32>
    %203 = arith.mulf %202, %201 : vector<8x32xf32>
    %cst_80 = arith.constant 5.000000e-01 : f32
    %204 = vector.broadcast %cst_80 : f32 to vector<8x32xf32>
    %205 = arith.addf %203, %204 : vector<8x32xf32>
    %206 = arith.mulf %195, %168 : vector<8x32xf32>
    %207 = arith.mulf %187, %197 : vector<8x32xf32>
    %208 = arith.addf %206, %207 : vector<8x32xf32>
    %209 = math.tanh %208 : vector<8x32xf32>
    %210 = arith.mulf %205, %209 : vector<8x32xf32>
    %211 = arith.index_cast %174 : i32 to index
    %c0_81 = arith.constant 0 : index
    %212 = vector.load %arg11[%211, %c0_81] : memref<64x32xf32, #tpu.memory_space<vmem>>, vector<8x32xf32>
    tpu.vector_store %arg11[%211, %c0_81], %210 {strides = array<i32>} : memref<64x32xf32, #tpu.memory_space<vmem>>, vector<8x32xf32>,
    %c5_i32 = arith.constant 5 : i32
    %c8_i32_82 = arith.constant 8 : i32
    %213 = arith.muli %c5_i32, %c8_i32_82 : i32
    %214 = tpu.assume_multiple %213, 8 : i32
    %215 = arith.index_cast %214 : i32 to index
    %c0_83 = arith.constant 0 : index
    %216 = vector.load %arg10[%215, %c0_83] : memref<64x128xf32, #tpu.memory_space<vmem>>, vector<8x128xf32>
    %c0_84 = arith.constant 0 : index
    %c0_85 = arith.constant 0 : index
    %217 = vector.load %arg3[%c0_84, %c0_85] : memref<32x128xf32, #tpu.memory_space<vmem>>, vector<32x128xf32>
    %cst_86 = arith.constant dense<0.000000e+00> : vector<8x128xf32>
    %218 = tpu.matmul %210, %217, %cst_86 {dimension_numbers = #tpu.dot_dimension_numbers<[1], [0], [0], [1], [0, 0, 1, 1], [], []>} : vector<8x32xf32>, vector<32x128xf32>, vector<8x128xf32> -> vector<8x128xf32>
    %219 = arith.addf %216, %218 : vector<8x128xf32>
    %220 = vector.extract_strided_slice %219 {offsets = [0, 0], sizes = [8, 32], strides = [1, 1]} : vector<8x128xf32> to vector<8x32xf32>
    %cst_87 = arith.constant 5.000000e-01 : f32
    %221 = vector.broadcast %cst_87 : f32 to vector<8x32xf32>
    %222 = arith.mulf %221, %220 : vector<8x32xf32>
    %223 = math.tanh %222 : vector<8x32xf32>
    %cst_88 = arith.constant 5.000000e-01 : f32
    %224 = vector.broadcast %cst_88 : f32 to vector<8x32xf32>
    %225 = arith.mulf %224, %223 : vector<8x32xf32>
    %cst_89 = arith.constant 5.000000e-01 : f32
    %226 = vector.broadcast %cst_89 : f32 to vector<8x32xf32>
    %227 = arith.addf %225, %226 : vector<8x32xf32>
    %228 = vector.extract_strided_slice %219 {offsets = [0, 32], sizes = [8, 32], strides = [1, 1]} : vector<8x128xf32> to vector<8x32xf32>
    %cst_90 = arith.constant 5.000000e-01 : f32
    %229 = vector.broadcast %cst_90 : f32 to vector<8x32xf32>
    %230 = arith.mulf %229, %228 : vector<8x32xf32>
    %231 = math.tanh %230 : vector<8x32xf32>
    %cst_91 = arith.constant 5.000000e-01 : f32
    %232 = vector.broadcast %cst_91 : f32 to vector<8x32xf32>
    %233 = arith.mulf %232, %231 : vector<8x32xf32>
    %cst_92 = arith.constant 5.000000e-01 : f32
    %234 = vector.broadcast %cst_92 : f32 to vector<8x32xf32>
    %235 = arith.addf %233, %234 : vector<8x32xf32>
    %236 = vector.extract_strided_slice %219 {offsets = [0, 64], sizes = [8, 32], strides = [1, 1]} : vector<8x128xf32> to vector<8x32xf32>
    %237 = math.tanh %236 : vector<8x32xf32>
    %238 = vector.extract_strided_slice %219 {offsets = [0, 96], sizes = [8, 32], strides = [1, 1]} : vector<8x128xf32> to vector<8x32xf32>
    %cst_93 = arith.constant 5.000000e-01 : f32
    %239 = vector.broadcast %cst_93 : f32 to vector<8x32xf32>
    %240 = arith.mulf %239, %238 : vector<8x32xf32>
    %241 = math.tanh %240 : vector<8x32xf32>
    %cst_94 = arith.constant 5.000000e-01 : f32
    %242 = vector.broadcast %cst_94 : f32 to vector<8x32xf32>
    %243 = arith.mulf %242, %241 : vector<8x32xf32>
    %cst_95 = arith.constant 5.000000e-01 : f32
    %244 = vector.broadcast %cst_95 : f32 to vector<8x32xf32>
    %245 = arith.addf %243, %244 : vector<8x32xf32>
    %246 = arith.mulf %235, %208 : vector<8x32xf32>
    %247 = arith.mulf %227, %237 : vector<8x32xf32>
    %248 = arith.addf %246, %247 : vector<8x32xf32>
    %249 = math.tanh %248 : vector<8x32xf32>
    %250 = arith.mulf %245, %249 : vector<8x32xf32>
    %251 = arith.index_cast %214 : i32 to index
    %c0_96 = arith.constant 0 : index
    %252 = vector.load %arg11[%251, %c0_96] : memref<64x32xf32, #tpu.memory_space<vmem>>, vector<8x32xf32>
    tpu.vector_store %arg11[%251, %c0_96], %250 {strides = array<i32>} : memref<64x32xf32, #tpu.memory_space<vmem>>, vector<8x32xf32>,
    %c6_i32 = arith.constant 6 : i32
    %c8_i32_97 = arith.constant 8 : i32
    %253 = arith.muli %c6_i32, %c8_i32_97 : i32
    %254 = tpu.assume_multiple %253, 8 : i32
    %255 = arith.index_cast %254 : i32 to index
    %c0_98 = arith.constant 0 : index
    %256 = vector.load %arg10[%255, %c0_98] : memref<64x128xf32, #tpu.memory_space<vmem>>, vector<8x128xf32>
    %c0_99 = arith.constant 0 : index
    %c0_100 = arith.constant 0 : index
    %257 = vector.load %arg3[%c0_99, %c0_100] : memref<32x128xf32, #tpu.memory_space<vmem>>, vector<32x128xf32>
    %cst_101 = arith.constant dense<0.000000e+00> : vector<8x128xf32>
    %258 = tpu.matmul %250, %257, %cst_101 {dimension_numbers = #tpu.dot_dimension_numbers<[1], [0], [0], [1], [0, 0, 1, 1], [], []>} : vector<8x32xf32>, vector<32x128xf32>, vector<8x128xf32> -> vector<8x128xf32>
    %259 = arith.addf %256, %258 : vector<8x128xf32>
    %260 = vector.extract_strided_slice %259 {offsets = [0, 0], sizes = [8, 32], strides = [1, 1]} : vector<8x128xf32> to vector<8x32xf32>
    %cst_102 = arith.constant 5.000000e-01 : f32
    %261 = vector.broadcast %cst_102 : f32 to vector<8x32xf32>
    %262 = arith.mulf %261, %260 : vector<8x32xf32>
    %263 = math.tanh %262 : vector<8x32xf32>
    %cst_103 = arith.constant 5.000000e-01 : f32
    %264 = vector.broadcast %cst_103 : f32 to vector<8x32xf32>
    %265 = arith.mulf %264, %263 : vector<8x32xf32>
    %cst_104 = arith.constant 5.000000e-01 : f32
    %266 = vector.broadcast %cst_104 : f32 to vector<8x32xf32>
    %267 = arith.addf %265, %266 : vector<8x32xf32>
    %268 = vector.extract_strided_slice %259 {offsets = [0, 32], sizes = [8, 32], strides = [1, 1]} : vector<8x128xf32> to vector<8x32xf32>
    %cst_105 = arith.constant 5.000000e-01 : f32
    %269 = vector.broadcast %cst_105 : f32 to vector<8x32xf32>
    %270 = arith.mulf %269, %268 : vector<8x32xf32>
    %271 = math.tanh %270 : vector<8x32xf32>
    %cst_106 = arith.constant 5.000000e-01 : f32
    %272 = vector.broadcast %cst_106 : f32 to vector<8x32xf32>
    %273 = arith.mulf %272, %271 : vector<8x32xf32>
    %cst_107 = arith.constant 5.000000e-01 : f32
    %274 = vector.broadcast %cst_107 : f32 to vector<8x32xf32>
    %275 = arith.addf %273, %274 : vector<8x32xf32>
    %276 = vector.extract_strided_slice %259 {offsets = [0, 64], sizes = [8, 32], strides = [1, 1]} : vector<8x128xf32> to vector<8x32xf32>
    %277 = math.tanh %276 : vector<8x32xf32>
    %278 = vector.extract_strided_slice %259 {offsets = [0, 96], sizes = [8, 32], strides = [1, 1]} : vector<8x128xf32> to vector<8x32xf32>
    %cst_108 = arith.constant 5.000000e-01 : f32
    %279 = vector.broadcast %cst_108 : f32 to vector<8x32xf32>
    %280 = arith.mulf %279, %278 : vector<8x32xf32>
    %281 = math.tanh %280 : vector<8x32xf32>
    %cst_109 = arith.constant 5.000000e-01 : f32
    %282 = vector.broadcast %cst_109 : f32 to vector<8x32xf32>
    %283 = arith.mulf %282, %281 : vector<8x32xf32>
    %cst_110 = arith.constant 5.000000e-01 : f32
    %284 = vector.broadcast %cst_110 : f32 to vector<8x32xf32>
    %285 = arith.addf %283, %284 : vector<8x32xf32>
    %286 = arith.mulf %275, %248 : vector<8x32xf32>
    %287 = arith.mulf %267, %277 : vector<8x32xf32>
    %288 = arith.addf %286, %287 : vector<8x32xf32>
    %289 = math.tanh %288 : vector<8x32xf32>
    %290 = arith.mulf %285, %289 : vector<8x32xf32>
    %291 = arith.index_cast %254 : i32 to index
    %c0_111 = arith.constant 0 : index
    %292 = vector.load %arg11[%291, %c0_111] : memref<64x32xf32, #tpu.memory_space<vmem>>, vector<8x32xf32>
    tpu.vector_store %arg11[%291, %c0_111], %290 {strides = array<i32>} : memref<64x32xf32, #tpu.memory_space<vmem>>, vector<8x32xf32>,
    %c7_i32 = arith.constant 7 : i32
    %c8_i32_112 = arith.constant 8 : i32
    %293 = arith.muli %c7_i32, %c8_i32_112 : i32
    %294 = tpu.assume_multiple %293, 8 : i32
    %295 = arith.index_cast %294 : i32 to index
    %c0_113 = arith.constant 0 : index
    %296 = vector.load %arg10[%295, %c0_113] : memref<64x128xf32, #tpu.memory_space<vmem>>, vector<8x128xf32>
    %c0_114 = arith.constant 0 : index
    %c0_115 = arith.constant 0 : index
    %297 = vector.load %arg3[%c0_114, %c0_115] : memref<32x128xf32, #tpu.memory_space<vmem>>, vector<32x128xf32>
    %cst_116 = arith.constant dense<0.000000e+00> : vector<8x128xf32>
    %298 = tpu.matmul %290, %297, %cst_116 {dimension_numbers = #tpu.dot_dimension_numbers<[1], [0], [0], [1], [0, 0, 1, 1], [], []>} : vector<8x32xf32>, vector<32x128xf32>, vector<8x128xf32> -> vector<8x128xf32>
    %299 = arith.addf %296, %298 : vector<8x128xf32>
    %300 = vector.extract_strided_slice %299 {offsets = [0, 0], sizes = [8, 32], strides = [1, 1]} : vector<8x128xf32> to vector<8x32xf32>
    %cst_117 = arith.constant 5.000000e-01 : f32
    %301 = vector.broadcast %cst_117 : f32 to vector<8x32xf32>
    %302 = arith.mulf %301, %300 : vector<8x32xf32>
    %303 = math.tanh %302 : vector<8x32xf32>
    %cst_118 = arith.constant 5.000000e-01 : f32
    %304 = vector.broadcast %cst_118 : f32 to vector<8x32xf32>
    %305 = arith.mulf %304, %303 : vector<8x32xf32>
    %cst_119 = arith.constant 5.000000e-01 : f32
    %306 = vector.broadcast %cst_119 : f32 to vector<8x32xf32>
    %307 = arith.addf %305, %306 : vector<8x32xf32>
    %308 = vector.extract_strided_slice %299 {offsets = [0, 32], sizes = [8, 32], strides = [1, 1]} : vector<8x128xf32> to vector<8x32xf32>
    %cst_120 = arith.constant 5.000000e-01 : f32
    %309 = vector.broadcast %cst_120 : f32 to vector<8x32xf32>
    %310 = arith.mulf %309, %308 : vector<8x32xf32>
    %311 = math.tanh %310 : vector<8x32xf32>
    %cst_121 = arith.constant 5.000000e-01 : f32
    %312 = vector.broadcast %cst_121 : f32 to vector<8x32xf32>
    %313 = arith.mulf %312, %311 : vector<8x32xf32>
    %cst_122 = arith.constant 5.000000e-01 : f32
    %314 = vector.broadcast %cst_122 : f32 to vector<8x32xf32>
    %315 = arith.addf %313, %314 : vector<8x32xf32>
    %316 = vector.extract_strided_slice %299 {offsets = [0, 64], sizes = [8, 32], strides = [1, 1]} : vector<8x128xf32> to vector<8x32xf32>
    %317 = math.tanh %316 : vector<8x32xf32>
    %318 = vector.extract_strided_slice %299 {offsets = [0, 96], sizes = [8, 32], strides = [1, 1]} : vector<8x128xf32> to vector<8x32xf32>
    %cst_123 = arith.constant 5.000000e-01 : f32
    %319 = vector.broadcast %cst_123 : f32 to vector<8x32xf32>
    %320 = arith.mulf %319, %318 : vector<8x32xf32>
    %321 = math.tanh %320 : vector<8x32xf32>
    %cst_124 = arith.constant 5.000000e-01 : f32
    %322 = vector.broadcast %cst_124 : f32 to vector<8x32xf32>
    %323 = arith.mulf %322, %321 : vector<8x32xf32>
    %cst_125 = arith.constant 5.000000e-01 : f32
    %324 = vector.broadcast %cst_125 : f32 to vector<8x32xf32>
    %325 = arith.addf %323, %324 : vector<8x32xf32>
    %326 = arith.mulf %315, %288 : vector<8x32xf32>
    %327 = arith.mulf %307, %317 : vector<8x32xf32>
    %328 = arith.addf %326, %327 : vector<8x32xf32>
    %329 = math.tanh %328 : vector<8x32xf32>
    %330 = arith.mulf %325, %329 : vector<8x32xf32>
    %331 = arith.index_cast %294 : i32 to index
    %c0_126 = arith.constant 0 : index
    %332 = vector.load %arg11[%331, %c0_126] : memref<64x32xf32, #tpu.memory_space<vmem>>, vector<8x32xf32>
    tpu.vector_store %arg11[%331, %c0_126], %330 {strides = array<i32>} : memref<64x32xf32, #tpu.memory_space<vmem>>, vector<8x32xf32>,
    %c8_i32_127 = arith.constant 8 : i32
    %c0_128 = arith.constant 0 : index
    %c0_129 = arith.constant 0 : index
    %333 = vector.load %arg11[%c0_128, %c0_129] : memref<64x32xf32, #tpu.memory_space<vmem>>, vector<64x32xf32>
    %c0_130 = arith.constant 0 : index
    %c0_131 = arith.constant 0 : index
    %334 = vector.load %arg4[%c0_130, %c0_131] : memref<32x128xf32, #tpu.memory_space<vmem>>, vector<32x128xf32>
    %cst_132 = arith.constant dense<0.000000e+00> : vector<64x128xf32>
    %335 = tpu.matmul %333, %334, %cst_132 {dimension_numbers = #tpu.dot_dimension_numbers<[1], [0], [0], [1], [0, 0, 1, 1], [], []>} : vector<64x32xf32>, vector<32x128xf32>, vector<64x128xf32> -> vector<64x128xf32>
    %c0_133 = arith.constant 0 : index
    %c0_134 = arith.constant 0 : index
    %336 = vector.load %arg6[%c0_133, %c0_134] : memref<1x128xf32, #tpu.memory_space<vmem>>, vector<1x128xf32>
    %337 = vector.broadcast %336 : vector<1x128xf32> to vector<64x128xf32>
    %338 = arith.addf %335, %337 : vector<64x128xf32>
    %c0_135 = arith.constant 0 : index
    %c0_136 = arith.constant 0 : index
    %339 = vector.load %arg12[%c0_135, %c0_136] : memref<64x128xf32, #tpu.memory_space<vmem>>, vector<64x128xf32>
    tpu.vector_store %arg12[%c0_135, %c0_136], %338 {strides = array<i32>} : memref<64x128xf32, #tpu.memory_space<vmem>>, vector<64x128xf32>,
    %c0_i32_137 = arith.constant 0 : i32
    %c8_i32_138 = arith.constant 8 : i32
    %340 = arith.muli %c0_i32_137, %c8_i32_138 : i32
    %341 = tpu.assume_multiple %340, 8 : i32
    %342 = arith.index_cast %341 : i32 to index
    %c0_139 = arith.constant 0 : index
    %343 = vector.load %arg12[%342, %c0_139] : memref<64x128xf32, #tpu.memory_space<vmem>>, vector<8x128xf32>
    %c0_140 = arith.constant 0 : index
    %c0_141 = arith.constant 0 : index
    %344 = vector.load %arg5[%c0_140, %c0_141] : memref<32x128xf32, #tpu.memory_space<vmem>>, vector<32x128xf32>
    %cst_142 = arith.constant dense<0.000000e+00> : vector<8x128xf32>
    %345 = tpu.matmul %12, %344, %cst_142 {dimension_numbers = #tpu.dot_dimension_numbers<[1], [0], [0], [1], [0, 0, 1, 1], [], []>} : vector<8x32xf32>, vector<32x128xf32>, vector<8x128xf32> -> vector<8x128xf32>
    %346 = arith.addf %343, %345 : vector<8x128xf32>
    %347 = vector.extract_strided_slice %346 {offsets = [0, 0], sizes = [8, 32], strides = [1, 1]} : vector<8x128xf32> to vector<8x32xf32>
    %cst_143 = arith.constant 5.000000e-01 : f32
    %348 = vector.broadcast %cst_143 : f32 to vector<8x32xf32>
    %349 = arith.mulf %348, %347 : vector<8x32xf32>
    %350 = math.tanh %349 : vector<8x32xf32>
    %cst_144 = arith.constant 5.000000e-01 : f32
    %351 = vector.broadcast %cst_144 : f32 to vector<8x32xf32>
    %352 = arith.mulf %351, %350 : vector<8x32xf32>
    %cst_145 = arith.constant 5.000000e-01 : f32
    %353 = vector.broadcast %cst_145 : f32 to vector<8x32xf32>
    %354 = arith.addf %352, %353 : vector<8x32xf32>
    %355 = vector.extract_strided_slice %346 {offsets = [0, 32], sizes = [8, 32], strides = [1, 1]} : vector<8x128xf32> to vector<8x32xf32>
    %cst_146 = arith.constant 5.000000e-01 : f32
    %356 = vector.broadcast %cst_146 : f32 to vector<8x32xf32>
    %357 = arith.mulf %356, %355 : vector<8x32xf32>
    %358 = math.tanh %357 : vector<8x32xf32>
    %cst_147 = arith.constant 5.000000e-01 : f32
    %359 = vector.broadcast %cst_147 : f32 to vector<8x32xf32>
    %360 = arith.mulf %359, %358 : vector<8x32xf32>
    %cst_148 = arith.constant 5.000000e-01 : f32
    %361 = vector.broadcast %cst_148 : f32 to vector<8x32xf32>
    %362 = arith.addf %360, %361 : vector<8x32xf32>
    %363 = vector.extract_strided_slice %346 {offsets = [0, 64], sizes = [8, 32], strides = [1, 1]} : vector<8x128xf32> to vector<8x32xf32>
    %364 = math.tanh %363 : vector<8x32xf32>
    %365 = vector.extract_strided_slice %346 {offsets = [0, 96], sizes = [8, 32], strides = [1, 1]} : vector<8x128xf32> to vector<8x32xf32>
    %cst_149 = arith.constant 5.000000e-01 : f32
    %366 = vector.broadcast %cst_149 : f32 to vector<8x32xf32>
    %367 = arith.mulf %366, %365 : vector<8x32xf32>
    %368 = math.tanh %367 : vector<8x32xf32>
    %cst_150 = arith.constant 5.000000e-01 : f32
    %369 = vector.broadcast %cst_150 : f32 to vector<8x32xf32>
    %370 = arith.mulf %369, %368 : vector<8x32xf32>
    %cst_151 = arith.constant 5.000000e-01 : f32
    %371 = vector.broadcast %cst_151 : f32 to vector<8x32xf32>
    %372 = arith.addf %370, %371 : vector<8x32xf32>
    %373 = arith.mulf %362, %12 : vector<8x32xf32>
    %374 = arith.mulf %354, %364 : vector<8x32xf32>
    %375 = arith.addf %373, %374 : vector<8x32xf32>
    %376 = math.tanh %375 : vector<8x32xf32>
    %377 = arith.mulf %372, %376 : vector<8x32xf32>
    %c1_i32_152 = arith.constant 1 : i32
    %c8_i32_153 = arith.constant 8 : i32
    %378 = arith.muli %c1_i32_152, %c8_i32_153 : i32
    %379 = tpu.assume_multiple %378, 8 : i32
    %380 = arith.index_cast %379 : i32 to index
    %c0_154 = arith.constant 0 : index
    %381 = vector.load %arg12[%380, %c0_154] : memref<64x128xf32, #tpu.memory_space<vmem>>, vector<8x128xf32>
    %c0_155 = arith.constant 0 : index
    %c0_156 = arith.constant 0 : index
    %382 = vector.load %arg5[%c0_155, %c0_156] : memref<32x128xf32, #tpu.memory_space<vmem>>, vector<32x128xf32>
    %cst_157 = arith.constant dense<0.000000e+00> : vector<8x128xf32>
    %383 = tpu.matmul %377, %382, %cst_157 {dimension_numbers = #tpu.dot_dimension_numbers<[1], [0], [0], [1], [0, 0, 1, 1], [], []>} : vector<8x32xf32>, vector<32x128xf32>, vector<8x128xf32> -> vector<8x128xf32>
    %384 = arith.addf %381, %383 : vector<8x128xf32>
    %385 = vector.extract_strided_slice %384 {offsets = [0, 0], sizes = [8, 32], strides = [1, 1]} : vector<8x128xf32> to vector<8x32xf32>
    %cst_158 = arith.constant 5.000000e-01 : f32
    %386 = vector.broadcast %cst_158 : f32 to vector<8x32xf32>
    %387 = arith.mulf %386, %385 : vector<8x32xf32>
    %388 = math.tanh %387 : vector<8x32xf32>
    %cst_159 = arith.constant 5.000000e-01 : f32
    %389 = vector.broadcast %cst_159 : f32 to vector<8x32xf32>
    %390 = arith.mulf %389, %388 : vector<8x32xf32>
    %cst_160 = arith.constant 5.000000e-01 : f32
    %391 = vector.broadcast %cst_160 : f32 to vector<8x32xf32>
    %392 = arith.addf %390, %391 : vector<8x32xf32>
    %393 = vector.extract_strided_slice %384 {offsets = [0, 32], sizes = [8, 32], strides = [1, 1]} : vector<8x128xf32> to vector<8x32xf32>
    %cst_161 = arith.constant 5.000000e-01 : f32
    %394 = vector.broadcast %cst_161 : f32 to vector<8x32xf32>
    %395 = arith.mulf %394, %393 : vector<8x32xf32>
    %396 = math.tanh %395 : vector<8x32xf32>
    %cst_162 = arith.constant 5.000000e-01 : f32
    %397 = vector.broadcast %cst_162 : f32 to vector<8x32xf32>
    %398 = arith.mulf %397, %396 : vector<8x32xf32>
    %cst_163 = arith.constant 5.000000e-01 : f32
    %399 = vector.broadcast %cst_163 : f32 to vector<8x32xf32>
    %400 = arith.addf %398, %399 : vector<8x32xf32>
    %401 = vector.extract_strided_slice %384 {offsets = [0, 64], sizes = [8, 32], strides = [1, 1]} : vector<8x128xf32> to vector<8x32xf32>
    %402 = math.tanh %401 : vector<8x32xf32>
    %403 = vector.extract_strided_slice %384 {offsets = [0, 96], sizes = [8, 32], strides = [1, 1]} : vector<8x128xf32> to vector<8x32xf32>
    %cst_164 = arith.constant 5.000000e-01 : f32
    %404 = vector.broadcast %cst_164 : f32 to vector<8x32xf32>
    %405 = arith.mulf %404, %403 : vector<8x32xf32>
    %406 = math.tanh %405 : vector<8x32xf32>
    %cst_165 = arith.constant 5.000000e-01 : f32
    %407 = vector.broadcast %cst_165 : f32 to vector<8x32xf32>
    %408 = arith.mulf %407, %406 : vector<8x32xf32>
    %cst_166 = arith.constant 5.000000e-01 : f32
    %409 = vector.broadcast %cst_166 : f32 to vector<8x32xf32>
    %410 = arith.addf %408, %409 : vector<8x32xf32>
    %411 = arith.mulf %400, %375 : vector<8x32xf32>
    %412 = arith.mulf %392, %402 : vector<8x32xf32>
    %413 = arith.addf %411, %412 : vector<8x32xf32>
    %414 = math.tanh %413 : vector<8x32xf32>
    %415 = arith.mulf %410, %414 : vector<8x32xf32>
    %c2_i32_167 = arith.constant 2 : i32
    %c8_i32_168 = arith.constant 8 : i32
    %416 = arith.muli %c2_i32_167, %c8_i32_168 : i32
    %417 = tpu.assume_multiple %416, 8 : i32
    %418 = arith.index_cast %417 : i32 to index
    %c0_169 = arith.constant 0 : index
    %419 = vector.load %arg12[%418, %c0_169] : memref<64x128xf32, #tpu.memory_space<vmem>>, vector<8x128xf32>
    %c0_170 = arith.constant 0 : index
    %c0_171 = arith.constant 0 : index
    %420 = vector.load %arg5[%c0_170, %c0_171] : memref<32x128xf32, #tpu.memory_space<vmem>>, vector<32x128xf32>
    %cst_172 = arith.constant dense<0.000000e+00> : vector<8x128xf32>
    %421 = tpu.matmul %415, %420, %cst_172 {dimension_numbers = #tpu.dot_dimension_numbers<[1], [0], [0], [1], [0, 0, 1, 1], [], []>} : vector<8x32xf32>, vector<32x128xf32>, vector<8x128xf32> -> vector<8x128xf32>
    %422 = arith.addf %419, %421 : vector<8x128xf32>
    %423 = vector.extract_strided_slice %422 {offsets = [0, 0], sizes = [8, 32], strides = [1, 1]} : vector<8x128xf32> to vector<8x32xf32>
    %cst_173 = arith.constant 5.000000e-01 : f32
    %424 = vector.broadcast %cst_173 : f32 to vector<8x32xf32>
    %425 = arith.mulf %424, %423 : vector<8x32xf32>
    %426 = math.tanh %425 : vector<8x32xf32>
    %cst_174 = arith.constant 5.000000e-01 : f32
    %427 = vector.broadcast %cst_174 : f32 to vector<8x32xf32>
    %428 = arith.mulf %427, %426 : vector<8x32xf32>
    %cst_175 = arith.constant 5.000000e-01 : f32
    %429 = vector.broadcast %cst_175 : f32 to vector<8x32xf32>
    %430 = arith.addf %428, %429 : vector<8x32xf32>
    %431 = vector.extract_strided_slice %422 {offsets = [0, 32], sizes = [8, 32], strides = [1, 1]} : vector<8x128xf32> to vector<8x32xf32>
    %cst_176 = arith.constant 5.000000e-01 : f32
    %432 = vector.broadcast %cst_176 : f32 to vector<8x32xf32>
    %433 = arith.mulf %432, %431 : vector<8x32xf32>
    %434 = math.tanh %433 : vector<8x32xf32>
    %cst_177 = arith.constant 5.000000e-01 : f32
    %435 = vector.broadcast %cst_177 : f32 to vector<8x32xf32>
    %436 = arith.mulf %435, %434 : vector<8x32xf32>
    %cst_178 = arith.constant 5.000000e-01 : f32
    %437 = vector.broadcast %cst_178 : f32 to vector<8x32xf32>
    %438 = arith.addf %436, %437 : vector<8x32xf32>
    %439 = vector.extract_strided_slice %422 {offsets = [0, 64], sizes = [8, 32], strides = [1, 1]} : vector<8x128xf32> to vector<8x32xf32>
    %440 = math.tanh %439 : vector<8x32xf32>
    %441 = vector.extract_strided_slice %422 {offsets = [0, 96], sizes = [8, 32], strides = [1, 1]} : vector<8x128xf32> to vector<8x32xf32>
    %cst_179 = arith.constant 5.000000e-01 : f32
    %442 = vector.broadcast %cst_179 : f32 to vector<8x32xf32>
    %443 = arith.mulf %442, %441 : vector<8x32xf32>
    %444 = math.tanh %443 : vector<8x32xf32>
    %cst_180 = arith.constant 5.000000e-01 : f32
    %445 = vector.broadcast %cst_180 : f32 to vector<8x32xf32>
    %446 = arith.mulf %445, %444 : vector<8x32xf32>
    %cst_181 = arith.constant 5.000000e-01 : f32
    %447 = vector.broadcast %cst_181 : f32 to vector<8x32xf32>
    %448 = arith.addf %446, %447 : vector<8x32xf32>
    %449 = arith.mulf %438, %413 : vector<8x32xf32>
    %450 = arith.mulf %430, %440 : vector<8x32xf32>
    %451 = arith.addf %449, %450 : vector<8x32xf32>
    %452 = math.tanh %451 : vector<8x32xf32>
    %453 = arith.mulf %448, %452 : vector<8x32xf32>
    %c3_i32_182 = arith.constant 3 : i32
    %c8_i32_183 = arith.constant 8 : i32
    %454 = arith.muli %c3_i32_182, %c8_i32_183 : i32
    %455 = tpu.assume_multiple %454, 8 : i32
    %456 = arith.index_cast %455 : i32 to index
    %c0_184 = arith.constant 0 : index
    %457 = vector.load %arg12[%456, %c0_184] : memref<64x128xf32, #tpu.memory_space<vmem>>, vector<8x128xf32>
    %c0_185 = arith.constant 0 : index
    %c0_186 = arith.constant 0 : index
    %458 = vector.load %arg5[%c0_185, %c0_186] : memref<32x128xf32, #tpu.memory_space<vmem>>, vector<32x128xf32>
    %cst_187 = arith.constant dense<0.000000e+00> : vector<8x128xf32>
    %459 = tpu.matmul %453, %458, %cst_187 {dimension_numbers = #tpu.dot_dimension_numbers<[1], [0], [0], [1], [0, 0, 1, 1], [], []>} : vector<8x32xf32>, vector<32x128xf32>, vector<8x128xf32> -> vector<8x128xf32>
    %460 = arith.addf %457, %459 : vector<8x128xf32>
    %461 = vector.extract_strided_slice %460 {offsets = [0, 0], sizes = [8, 32], strides = [1, 1]} : vector<8x128xf32> to vector<8x32xf32>
    %cst_188 = arith.constant 5.000000e-01 : f32
    %462 = vector.broadcast %cst_188 : f32 to vector<8x32xf32>
    %463 = arith.mulf %462, %461 : vector<8x32xf32>
    %464 = math.tanh %463 : vector<8x32xf32>
    %cst_189 = arith.constant 5.000000e-01 : f32
    %465 = vector.broadcast %cst_189 : f32 to vector<8x32xf32>
    %466 = arith.mulf %465, %464 : vector<8x32xf32>
    %cst_190 = arith.constant 5.000000e-01 : f32
    %467 = vector.broadcast %cst_190 : f32 to vector<8x32xf32>
    %468 = arith.addf %466, %467 : vector<8x32xf32>
    %469 = vector.extract_strided_slice %460 {offsets = [0, 32], sizes = [8, 32], strides = [1, 1]} : vector<8x128xf32> to vector<8x32xf32>
    %cst_191 = arith.constant 5.000000e-01 : f32
    %470 = vector.broadcast %cst_191 : f32 to vector<8x32xf32>
    %471 = arith.mulf %470, %469 : vector<8x32xf32>
    %472 = math.tanh %471 : vector<8x32xf32>
    %cst_192 = arith.constant 5.000000e-01 : f32
    %473 = vector.broadcast %cst_192 : f32 to vector<8x32xf32>
    %474 = arith.mulf %473, %472 : vector<8x32xf32>
    %cst_193 = arith.constant 5.000000e-01 : f32
    %475 = vector.broadcast %cst_193 : f32 to vector<8x32xf32>
    %476 = arith.addf %474, %475 : vector<8x32xf32>
    %477 = vector.extract_strided_slice %460 {offsets = [0, 64], sizes = [8, 32], strides = [1, 1]} : vector<8x128xf32> to vector<8x32xf32>
    %478 = math.tanh %477 : vector<8x32xf32>
    %479 = vector.extract_strided_slice %460 {offsets = [0, 96], sizes = [8, 32], strides = [1, 1]} : vector<8x128xf32> to vector<8x32xf32>
    %cst_194 = arith.constant 5.000000e-01 : f32
    %480 = vector.broadcast %cst_194 : f32 to vector<8x32xf32>
    %481 = arith.mulf %480, %479 : vector<8x32xf32>
    %482 = math.tanh %481 : vector<8x32xf32>
    %cst_195 = arith.constant 5.000000e-01 : f32
    %483 = vector.broadcast %cst_195 : f32 to vector<8x32xf32>
    %484 = arith.mulf %483, %482 : vector<8x32xf32>
    %cst_196 = arith.constant 5.000000e-01 : f32
    %485 = vector.broadcast %cst_196 : f32 to vector<8x32xf32>
    %486 = arith.addf %484, %485 : vector<8x32xf32>
    %487 = arith.mulf %476, %451 : vector<8x32xf32>
    %488 = arith.mulf %468, %478 : vector<8x32xf32>
    %489 = arith.addf %487, %488 : vector<8x32xf32>
    %490 = math.tanh %489 : vector<8x32xf32>
    %491 = arith.mulf %486, %490 : vector<8x32xf32>
    %c4_i32_197 = arith.constant 4 : i32
    %c8_i32_198 = arith.constant 8 : i32
    %492 = arith.muli %c4_i32_197, %c8_i32_198 : i32
    %493 = tpu.assume_multiple %492, 8 : i32
    %494 = arith.index_cast %493 : i32 to index
    %c0_199 = arith.constant 0 : index
    %495 = vector.load %arg12[%494, %c0_199] : memref<64x128xf32, #tpu.memory_space<vmem>>, vector<8x128xf32>
    %c0_200 = arith.constant 0 : index
    %c0_201 = arith.constant 0 : index
    %496 = vector.load %arg5[%c0_200, %c0_201] : memref<32x128xf32, #tpu.memory_space<vmem>>, vector<32x128xf32>
    %cst_202 = arith.constant dense<0.000000e+00> : vector<8x128xf32>
    %497 = tpu.matmul %491, %496, %cst_202 {dimension_numbers = #tpu.dot_dimension_numbers<[1], [0], [0], [1], [0, 0, 1, 1], [], []>} : vector<8x32xf32>, vector<32x128xf32>, vector<8x128xf32> -> vector<8x128xf32>
    %498 = arith.addf %495, %497 : vector<8x128xf32>
    %499 = vector.extract_strided_slice %498 {offsets = [0, 0], sizes = [8, 32], strides = [1, 1]} : vector<8x128xf32> to vector<8x32xf32>
    %cst_203 = arith.constant 5.000000e-01 : f32
    %500 = vector.broadcast %cst_203 : f32 to vector<8x32xf32>
    %501 = arith.mulf %500, %499 : vector<8x32xf32>
    %502 = math.tanh %501 : vector<8x32xf32>
    %cst_204 = arith.constant 5.000000e-01 : f32
    %503 = vector.broadcast %cst_204 : f32 to vector<8x32xf32>
    %504 = arith.mulf %503, %502 : vector<8x32xf32>
    %cst_205 = arith.constant 5.000000e-01 : f32
    %505 = vector.broadcast %cst_205 : f32 to vector<8x32xf32>
    %506 = arith.addf %504, %505 : vector<8x32xf32>
    %507 = vector.extract_strided_slice %498 {offsets = [0, 32], sizes = [8, 32], strides = [1, 1]} : vector<8x128xf32> to vector<8x32xf32>
    %cst_206 = arith.constant 5.000000e-01 : f32
    %508 = vector.broadcast %cst_206 : f32 to vector<8x32xf32>
    %509 = arith.mulf %508, %507 : vector<8x32xf32>
    %510 = math.tanh %509 : vector<8x32xf32>
    %cst_207 = arith.constant 5.000000e-01 : f32
    %511 = vector.broadcast %cst_207 : f32 to vector<8x32xf32>
    %512 = arith.mulf %511, %510 : vector<8x32xf32>
    %cst_208 = arith.constant 5.000000e-01 : f32
    %513 = vector.broadcast %cst_208 : f32 to vector<8x32xf32>
    %514 = arith.addf %512, %513 : vector<8x32xf32>
    %515 = vector.extract_strided_slice %498 {offsets = [0, 64], sizes = [8, 32], strides = [1, 1]} : vector<8x128xf32> to vector<8x32xf32>
    %516 = math.tanh %515 : vector<8x32xf32>
    %517 = vector.extract_strided_slice %498 {offsets = [0, 96], sizes = [8, 32], strides = [1, 1]} : vector<8x128xf32> to vector<8x32xf32>
    %cst_209 = arith.constant 5.000000e-01 : f32
    %518 = vector.broadcast %cst_209 : f32 to vector<8x32xf32>
    %519 = arith.mulf %518, %517 : vector<8x32xf32>
    %520 = math.tanh %519 : vector<8x32xf32>
    %cst_210 = arith.constant 5.000000e-01 : f32
    %521 = vector.broadcast %cst_210 : f32 to vector<8x32xf32>
    %522 = arith.mulf %521, %520 : vector<8x32xf32>
    %cst_211 = arith.constant 5.000000e-01 : f32
    %523 = vector.broadcast %cst_211 : f32 to vector<8x32xf32>
    %524 = arith.addf %522, %523 : vector<8x32xf32>
    %525 = arith.mulf %514, %489 : vector<8x32xf32>
    %526 = arith.mulf %506, %516 : vector<8x32xf32>
    %527 = arith.addf %525, %526 : vector<8x32xf32>
    %528 = math.tanh %527 : vector<8x32xf32>
    %529 = arith.mulf %524, %528 : vector<8x32xf32>
    %c5_i32_212 = arith.constant 5 : i32
    %c8_i32_213 = arith.constant 8 : i32
    %530 = arith.muli %c5_i32_212, %c8_i32_213 : i32
    %531 = tpu.assume_multiple %530, 8 : i32
    %532 = arith.index_cast %531 : i32 to index
    %c0_214 = arith.constant 0 : index
    %533 = vector.load %arg12[%532, %c0_214] : memref<64x128xf32, #tpu.memory_space<vmem>>, vector<8x128xf32>
    %c0_215 = arith.constant 0 : index
    %c0_216 = arith.constant 0 : index
    %534 = vector.load %arg5[%c0_215, %c0_216] : memref<32x128xf32, #tpu.memory_space<vmem>>, vector<32x128xf32>
    %cst_217 = arith.constant dense<0.000000e+00> : vector<8x128xf32>
    %535 = tpu.matmul %529, %534, %cst_217 {dimension_numbers = #tpu.dot_dimension_numbers<[1], [0], [0], [1], [0, 0, 1, 1], [], []>} : vector<8x32xf32>, vector<32x128xf32>, vector<8x128xf32> -> vector<8x128xf32>
    %536 = arith.addf %533, %535 : vector<8x128xf32>
    %537 = vector.extract_strided_slice %536 {offsets = [0, 0], sizes = [8, 32], strides = [1, 1]} : vector<8x128xf32> to vector<8x32xf32>
    %cst_218 = arith.constant 5.000000e-01 : f32
    %538 = vector.broadcast %cst_218 : f32 to vector<8x32xf32>
    %539 = arith.mulf %538, %537 : vector<8x32xf32>
    %540 = math.tanh %539 : vector<8x32xf32>
    %cst_219 = arith.constant 5.000000e-01 : f32
    %541 = vector.broadcast %cst_219 : f32 to vector<8x32xf32>
    %542 = arith.mulf %541, %540 : vector<8x32xf32>
    %cst_220 = arith.constant 5.000000e-01 : f32
    %543 = vector.broadcast %cst_220 : f32 to vector<8x32xf32>
    %544 = arith.addf %542, %543 : vector<8x32xf32>
    %545 = vector.extract_strided_slice %536 {offsets = [0, 32], sizes = [8, 32], strides = [1, 1]} : vector<8x128xf32> to vector<8x32xf32>
    %cst_221 = arith.constant 5.000000e-01 : f32
    %546 = vector.broadcast %cst_221 : f32 to vector<8x32xf32>
    %547 = arith.mulf %546, %545 : vector<8x32xf32>
    %548 = math.tanh %547 : vector<8x32xf32>
    %cst_222 = arith.constant 5.000000e-01 : f32
    %549 = vector.broadcast %cst_222 : f32 to vector<8x32xf32>
    %550 = arith.mulf %549, %548 : vector<8x32xf32>
    %cst_223 = arith.constant 5.000000e-01 : f32
    %551 = vector.broadcast %cst_223 : f32 to vector<8x32xf32>
    %552 = arith.addf %550, %551 : vector<8x32xf32>
    %553 = vector.extract_strided_slice %536 {offsets = [0, 64], sizes = [8, 32], strides = [1, 1]} : vector<8x128xf32> to vector<8x32xf32>
    %554 = math.tanh %553 : vector<8x32xf32>
    %555 = vector.extract_strided_slice %536 {offsets = [0, 96], sizes = [8, 32], strides = [1, 1]} : vector<8x128xf32> to vector<8x32xf32>
    %cst_224 = arith.constant 5.000000e-01 : f32
    %556 = vector.broadcast %cst_224 : f32 to vector<8x32xf32>
    %557 = arith.mulf %556, %555 : vector<8x32xf32>
    %558 = math.tanh %557 : vector<8x32xf32>
    %cst_225 = arith.constant 5.000000e-01 : f32
    %559 = vector.broadcast %cst_225 : f32 to vector<8x32xf32>
    %560 = arith.mulf %559, %558 : vector<8x32xf32>
    %cst_226 = arith.constant 5.000000e-01 : f32
    %561 = vector.broadcast %cst_226 : f32 to vector<8x32xf32>
    %562 = arith.addf %560, %561 : vector<8x32xf32>
    %563 = arith.mulf %552, %527 : vector<8x32xf32>
    %564 = arith.mulf %544, %554 : vector<8x32xf32>
    %565 = arith.addf %563, %564 : vector<8x32xf32>
    %566 = math.tanh %565 : vector<8x32xf32>
    %567 = arith.mulf %562, %566 : vector<8x32xf32>
    %c6_i32_227 = arith.constant 6 : i32
    %c8_i32_228 = arith.constant 8 : i32
    %568 = arith.muli %c6_i32_227, %c8_i32_228 : i32
    %569 = tpu.assume_multiple %568, 8 : i32
    %570 = arith.index_cast %569 : i32 to index
    %c0_229 = arith.constant 0 : index
    %571 = vector.load %arg12[%570, %c0_229] : memref<64x128xf32, #tpu.memory_space<vmem>>, vector<8x128xf32>
    %c0_230 = arith.constant 0 : index
    %c0_231 = arith.constant 0 : index
    %572 = vector.load %arg5[%c0_230, %c0_231] : memref<32x128xf32, #tpu.memory_space<vmem>>, vector<32x128xf32>
    %cst_232 = arith.constant dense<0.000000e+00> : vector<8x128xf32>
    %573 = tpu.matmul %567, %572, %cst_232 {dimension_numbers = #tpu.dot_dimension_numbers<[1], [0], [0], [1], [0, 0, 1, 1], [], []>} : vector<8x32xf32>, vector<32x128xf32>, vector<8x128xf32> -> vector<8x128xf32>
    %574 = arith.addf %571, %573 : vector<8x128xf32>
    %575 = vector.extract_strided_slice %574 {offsets = [0, 0], sizes = [8, 32], strides = [1, 1]} : vector<8x128xf32> to vector<8x32xf32>
    %cst_233 = arith.constant 5.000000e-01 : f32
    %576 = vector.broadcast %cst_233 : f32 to vector<8x32xf32>
    %577 = arith.mulf %576, %575 : vector<8x32xf32>
    %578 = math.tanh %577 : vector<8x32xf32>
    %cst_234 = arith.constant 5.000000e-01 : f32
    %579 = vector.broadcast %cst_234 : f32 to vector<8x32xf32>
    %580 = arith.mulf %579, %578 : vector<8x32xf32>
    %cst_235 = arith.constant 5.000000e-01 : f32
    %581 = vector.broadcast %cst_235 : f32 to vector<8x32xf32>
    %582 = arith.addf %580, %581 : vector<8x32xf32>
    %583 = vector.extract_strided_slice %574 {offsets = [0, 32], sizes = [8, 32], strides = [1, 1]} : vector<8x128xf32> to vector<8x32xf32>
    %cst_236 = arith.constant 5.000000e-01 : f32
    %584 = vector.broadcast %cst_236 : f32 to vector<8x32xf32>
    %585 = arith.mulf %584, %583 : vector<8x32xf32>
    %586 = math.tanh %585 : vector<8x32xf32>
    %cst_237 = arith.constant 5.000000e-01 : f32
    %587 = vector.broadcast %cst_237 : f32 to vector<8x32xf32>
    %588 = arith.mulf %587, %586 : vector<8x32xf32>
    %cst_238 = arith.constant 5.000000e-01 : f32
    %589 = vector.broadcast %cst_238 : f32 to vector<8x32xf32>
    %590 = arith.addf %588, %589 : vector<8x32xf32>
    %591 = vector.extract_strided_slice %574 {offsets = [0, 64], sizes = [8, 32], strides = [1, 1]} : vector<8x128xf32> to vector<8x32xf32>
    %592 = math.tanh %591 : vector<8x32xf32>
    %593 = vector.extract_strided_slice %574 {offsets = [0, 96], sizes = [8, 32], strides = [1, 1]} : vector<8x128xf32> to vector<8x32xf32>
    %cst_239 = arith.constant 5.000000e-01 : f32
    %594 = vector.broadcast %cst_239 : f32 to vector<8x32xf32>
    %595 = arith.mulf %594, %593 : vector<8x32xf32>
    %596 = math.tanh %595 : vector<8x32xf32>
    %cst_240 = arith.constant 5.000000e-01 : f32
    %597 = vector.broadcast %cst_240 : f32 to vector<8x32xf32>
    %598 = arith.mulf %597, %596 : vector<8x32xf32>
    %cst_241 = arith.constant 5.000000e-01 : f32
    %599 = vector.broadcast %cst_241 : f32 to vector<8x32xf32>
    %600 = arith.addf %598, %599 : vector<8x32xf32>
    %601 = arith.mulf %590, %565 : vector<8x32xf32>
    %602 = arith.mulf %582, %592 : vector<8x32xf32>
    %603 = arith.addf %601, %602 : vector<8x32xf32>
    %604 = math.tanh %603 : vector<8x32xf32>
    %605 = arith.mulf %600, %604 : vector<8x32xf32>
    %c7_i32_242 = arith.constant 7 : i32
    %c8_i32_243 = arith.constant 8 : i32
    %606 = arith.muli %c7_i32_242, %c8_i32_243 : i32
    %607 = tpu.assume_multiple %606, 8 : i32
    %608 = arith.index_cast %607 : i32 to index
    %c0_244 = arith.constant 0 : index
    %609 = vector.load %arg12[%608, %c0_244] : memref<64x128xf32, #tpu.memory_space<vmem>>, vector<8x128xf32>
    %c0_245 = arith.constant 0 : index
    %c0_246 = arith.constant 0 : index
    %610 = vector.load %arg5[%c0_245, %c0_246] : memref<32x128xf32, #tpu.memory_space<vmem>>, vector<32x128xf32>
    %cst_247 = arith.constant dense<0.000000e+00> : vector<8x128xf32>
    %611 = tpu.matmul %605, %610, %cst_247 {dimension_numbers = #tpu.dot_dimension_numbers<[1], [0], [0], [1], [0, 0, 1, 1], [], []>} : vector<8x32xf32>, vector<32x128xf32>, vector<8x128xf32> -> vector<8x128xf32>
    %612 = arith.addf %609, %611 : vector<8x128xf32>
    %613 = vector.extract_strided_slice %612 {offsets = [0, 0], sizes = [8, 32], strides = [1, 1]} : vector<8x128xf32> to vector<8x32xf32>
    %cst_248 = arith.constant 5.000000e-01 : f32
    %614 = vector.broadcast %cst_248 : f32 to vector<8x32xf32>
    %615 = arith.mulf %614, %613 : vector<8x32xf32>
    %616 = math.tanh %615 : vector<8x32xf32>
    %cst_249 = arith.constant 5.000000e-01 : f32
    %617 = vector.broadcast %cst_249 : f32 to vector<8x32xf32>
    %618 = arith.mulf %617, %616 : vector<8x32xf32>
    %cst_250 = arith.constant 5.000000e-01 : f32
    %619 = vector.broadcast %cst_250 : f32 to vector<8x32xf32>
    %620 = arith.addf %618, %619 : vector<8x32xf32>
    %621 = vector.extract_strided_slice %612 {offsets = [0, 32], sizes = [8, 32], strides = [1, 1]} : vector<8x128xf32> to vector<8x32xf32>
    %cst_251 = arith.constant 5.000000e-01 : f32
    %622 = vector.broadcast %cst_251 : f32 to vector<8x32xf32>
    %623 = arith.mulf %622, %621 : vector<8x32xf32>
    %624 = math.tanh %623 : vector<8x32xf32>
    %cst_252 = arith.constant 5.000000e-01 : f32
    %625 = vector.broadcast %cst_252 : f32 to vector<8x32xf32>
    %626 = arith.mulf %625, %624 : vector<8x32xf32>
    %cst_253 = arith.constant 5.000000e-01 : f32
    %627 = vector.broadcast %cst_253 : f32 to vector<8x32xf32>
    %628 = arith.addf %626, %627 : vector<8x32xf32>
    %629 = vector.extract_strided_slice %612 {offsets = [0, 64], sizes = [8, 32], strides = [1, 1]} : vector<8x128xf32> to vector<8x32xf32>
    %630 = math.tanh %629 : vector<8x32xf32>
    %631 = vector.extract_strided_slice %612 {offsets = [0, 96], sizes = [8, 32], strides = [1, 1]} : vector<8x128xf32> to vector<8x32xf32>
    %cst_254 = arith.constant 5.000000e-01 : f32
    %632 = vector.broadcast %cst_254 : f32 to vector<8x32xf32>
    %633 = arith.mulf %632, %631 : vector<8x32xf32>
    %634 = math.tanh %633 : vector<8x32xf32>
    %cst_255 = arith.constant 5.000000e-01 : f32
    %635 = vector.broadcast %cst_255 : f32 to vector<8x32xf32>
    %636 = arith.mulf %635, %634 : vector<8x32xf32>
    %cst_256 = arith.constant 5.000000e-01 : f32
    %637 = vector.broadcast %cst_256 : f32 to vector<8x32xf32>
    %638 = arith.addf %636, %637 : vector<8x32xf32>
    %639 = arith.mulf %628, %603 : vector<8x32xf32>
    %640 = arith.mulf %620, %630 : vector<8x32xf32>
    %641 = arith.addf %639, %640 : vector<8x32xf32>
    %642 = math.tanh %641 : vector<8x32xf32>
    %643 = arith.mulf %638, %642 : vector<8x32xf32>
    %c8_i32_257 = arith.constant 8 : i32
    %c0_258 = arith.constant 0 : index
    %c0_259 = arith.constant 0 : index
    %644 = vector.load %arg7[%c0_258, %c0_259] : memref<32x128xf32, #tpu.memory_space<vmem>>, vector<32x128xf32>
    %cst_260 = arith.constant dense<0.000000e+00> : vector<8x128xf32>
    %645 = tpu.matmul %643, %644, %cst_260 {dimension_numbers = #tpu.dot_dimension_numbers<[1], [0], [0], [1], [0, 0, 1, 1], [], []>} : vector<8x32xf32>, vector<32x128xf32>, vector<8x128xf32> -> vector<8x128xf32>
    %c0_261 = arith.constant 0 : index
    %c0_262 = arith.constant 0 : index
    %646 = vector.load %arg8[%c0_261, %c0_262] : memref<1x128xf32, #tpu.memory_space<vmem>>, vector<1x128xf32>
    %647 = vector.broadcast %646 : vector<1x128xf32> to vector<8x128xf32>
    %648 = arith.addf %645, %647 : vector<8x128xf32>
    %c0_263 = arith.constant 0 : index
    %c0_264 = arith.constant 0 : index
    %649 = vector.load %arg9[%c0_263, %c0_264] : memref<8x128xf32, #tpu.memory_space<vmem>>, vector<8x128xf32>
    tpu.vector_store %arg9[%c0_263, %c0_264], %648 {strides = array<i32>} : memref<8x128xf32, #tpu.memory_space<vmem>>, vector<8x128xf32>,
    return
  }
}

</mosaic_0001>

<bundles_post_ra>
// kernel: recurrent_network_forward.1
= control target key start
LH: loop header
LB: loop body
LE: loop exit
PB: predicated region body
PF: predicated region fallthrough
CT: control target
= control target key end

     0   :  { %14 = vsyncpa [#allocation6], 0  ;;  %s3298_s0 = inlined_call_operand.vmem [shape: s32[64,1], index: 0, kind: input, shape index: {}]   ;;  %s3299_s1 = inlined_call_operand.hbm [shape: f32[128,128], index: 1, kind: input, shape index: {}]   ;;  %s3300_s2 = inlined_call_operand.vmem [shape: f32[1,128], index: 2, kind: input, shape index: {}]   ;;  %s3301_s3 = inlined_call_operand.vmem [shape: f32[32,128], index: 3, kind: input, shape index: {}]   ;;  %s3302_s4 = inlined_call_operand.vmem [shape: f32[32,128], index: 4, kind: input, shape index: {}]   ;;  %s3303_s5 = inlined_call_operand.vmem [shape: f32[32,128], index: 5, kind: input, shape index: {}]   ;;  %s3304_s6 = inlined_call_operand.vmem [shape: f32[1,128], index: 6, kind: input, shape index: {}]   ;;  %s3305_s7 = inlined_call_operand.hbm [shape: f32[32,128], index: 7, kind: input, shape index: {}]   ;;  %s3306_s8 = inlined_call_operand.vmem [shape: f32[1,128], index: 8, kind: input, shape index: {}]   ;;  %s3307_s9 = inlined_call_operand.vmem [shape: f32[8,128], index: 9, kind: output, shape index: {}]  }
   0x1   :  { %15 = vsyncpa [#allocation8], 0  ;;  %s2870_s30 = smov [#allocation5]   ;;  %s2822_s13 = scalar_lea.hbm %s3299_s1, 2048 }
   0x2   :  { %s23_s10 = sshll.u32 %s2870_s30, 4  ;;  %p2823_p0 = scmp.ne.s32.totalorder %s3299_s1, %s2822_s13  ;;  %s24_s10 = int_to_ptr.vmem [resolvable:$true] %s23_s10 }
   0x3   :  { %p2826_p1 = scmp.lt.u32.totalorder %s2822_s13, %s3299_s1 }
   0x5   :  { %p2828_p2 = pnand %p2826_p1, %p2823_p0 }
   0x7   :  { %2831 = shalt.err (!%p2828_p2)
}
   0x8   :  { %s2832_s18 = scalar_lea.vmem %s24_s10, 2048  ;;  %p2837_p4 = scmp.lt.s32.totalorder %s24_s10, %s24_s10 }
   0x9   :  { %p2833_p3 = scmp.ne.s32.totalorder %s24_s10, %s2832_s18  ;;  %p2838_p5 = scmp.lt.s32.totalorder %s2832_s18, %s2832_s18 }
   0xb   :  { %p2839_p6 = por %p2838_p5, %p2837_p4 }
   0xd   :  { %p2840_p7 = pnand %p2839_p6, %p2833_p3 }
   0xf   :  { %2843 = shalt.err (!%p2840_p7)
}
  0x10   :  { %s2871_s19 = smov 128   ;;  %s2872_s20 = smov 8  }
  0x11   :  { %29 = dma.hbm_to_vmem [thread:$0]  %s3299_s1, 2048, %s24_s10, [#allocation6], %s2871_s19, %s2871_s19, %s2872_s20  }
  0x12   :  { %s2873_s23 = smov [#allocation7]   ;;  %s2844_s27 = scalar_lea.hbm %s3305_s7, 512 }
  0x13   :  { %s45_s24 = sshll.u32 %s2873_s23, 4  ;;  %p2845_p8 = scmp.ne.s32.totalorder %s3305_s7, %s2844_s27  ;;  %s46_s24 = int_to_ptr.vmem [resolvable:$true] %s45_s24 }
  0x14   :  { %p2848_p9 = scmp.lt.u32.totalorder %s2844_s27, %s3305_s7 }
  0x16   :  { %p2850_p10 = pnand %p2848_p9, %p2845_p8 }
  0x18   :  { %2853 = shalt.err (!%p2850_p10)
}
  0x19   :  { %s2854_s12 = scalar_lea.vmem %s46_s24, 512  ;;  %p2859_p12 = scmp.lt.s32.totalorder %s46_s24, %s46_s24 }
  0x1a   :  { %p2855_p11 = scmp.ne.s32.totalorder %s46_s24, %s2854_s12  ;;  %p2860_p13 = scmp.lt.s32.totalorder %s2854_s12, %s2854_s12 }
  0x1c   :  { %p2861_p0 = por %p2860_p13, %p2859_p12 }
  0x1e   :  { %p2862_p1 = pnand %p2861_p0, %p2855_p11 }
  0x20   :  { %2865 = shalt.err (!%p2862_p1)
}
  0x21   :  { %51 = dma.hbm_to_vmem [thread:$0]  %s3305_s7, 512, %s46_s24, [#allocation8], %s2871_s19, %s2871_s19, %s2872_s20  }
  0x22   :  { %2866 = dma.done.wait [#allocation6], 2048  }
  0x23   :  { %2867 = vsyncadd [#allocation6], 4294965248 }
  0x24   :  { %2868 = dma.done.wait [#allocation8], 512  }
  0x25   :  { %2869 = vsyncadd [#allocation8], 4294966784  ;;  %v2874_v0 = vmov 0   ;;  %v2875_v1 = vmov 0.0|0.0   ;;  %v60_v2 = vld [vmem:[%s3298_s0] sm:$0xff]  ;;  %v119_v4 = vld [vmem:[#allocation5 + $0x8] sm:$0xff]  ;;  %v68_v35 = vlaneseq }
  0x26   :  { %2724 = vset.pattern.permute.xlu0 %v2874_v0  ;;  %2603 = vmatprep.subr.bf16.mxu1 %v2875_v1  ;;  %v118_v3 = vld [vmem:[#allocation5] sm:$0xff]  ;;  %v120_v5 = vld [vmem:[#allocation5 + $0x10] sm:$0xff]  ;;  %v121_v6 = vld [vmem:[#allocation5 + $0x18] sm:$0xff]  ;;  %vm2876_vm0 = vmmov 0   ;;  %v2877_v20 = vmov 0.0   ;;  %v2878_v38 = vmov 1.0  }
  0x27   :  { %2725 = vset.pattern.permute.xlu1 %v2874_v0  ;;  %71 = vperm.xlu0 %2724, %v60_v2   ;;  %v61_v7 = vld [vmem:[%s3298_s0 + $0x8] sm:$0xff]  ;;  %v2571_v8 = vpack.c.bf16 %v119_v4, %v118_v3  ;;  %v2575_v9 = vpack.c.bf16 %v121_v6, %v120_v5  ;;  %v122_v10 = vld [vmem:[#allocation5 + $0x20] sm:$0xff]  ;;  %v257_v16 = vld [vmem:[%s3301_s3 + $0x10] sm:$0xff]  ;;  %v2992_v36 = vand.u32 127, %v68_v35  ;;  %s2879_s25 = smov 64   ;;  %s2880_s26 = smov 32  }
  0x28   :  { %v123_v11 = vld [vmem:[#allocation5 + $0x28] sm:$0xff]  ;;  %v255_v12 = vld [vmem:[%s3301_s3] sm:$0xff]  ;;  %v124_v17 = vld [vmem:[#allocation5 + $0x30] sm:$0xff]  ;;  %2372 = vmatprep.mubr.msk.f32.mxu1 %vm2876_vm0, %v2877_v20  ;;  %vm259_vm3 = vcmask 261120  }
  0x29   :  { %2572 = vmatprep.subr.bf16.mxu0 %v2571_v8  ;;  %v256_v13 = vld [vmem:[%s3301_s3 + $0x8] sm:$0xff]  ;;  %v2579_v14 = vpack.c.bf16 %v123_v11, %v122_v10  ;;  %v125_v18 = vld [vmem:[#allocation5 + $0x38] sm:$0xff]  ;;  %v126_v23 = vld [vmem:[#allocation5 + $0x40] sm:$0xff] }
  0x2a   :  { %2574 = vmatpush3.bf16.msra.mxu0 %v2571_v8  ;;  %v2968_v15 = vpack.c.bf16 %v256_v13, %v255_v12  ;;  %v258_v19 = vld [vmem:[%s3301_s3 + $0x18] sm:$0xff]  ;;  %v2583_v22 = vpack.c.bf16 %v125_v18, %v124_v17  ;;  %v127_v24 = vld [vmem:[#allocation5 + $0x48] sm:$0xff]  ;;  %v128_v26 = vld [vmem:[#allocation5 + $0x50] sm:$0xff] }
  0x2b   :  { %74 = vperm.xlu0 %2724, %v61_v7   ;;  %2576 = vmatprep.subr.bf16.mxu0 %v2575_v9  ;;  %v2979_v21 = vpack.c.bf16 %v258_v19, %v257_v16  ;;  %v2587_v25 = vpack.c.bf16 %v127_v24, %v126_v23  ;;  %v129_v27 = vld [vmem:[#allocation5 + $0x58] sm:$0xff]  ;;  %v130_v29 = vld [vmem:[#allocation5 + $0x60] sm:$0xff]  ;;  %v131_v30 = vld [vmem:[#allocation5 + $0x68] sm:$0xff] }
  0x2c   :  { %2605 = vmatpush3.bf16.msra.mxu1 %v2968_v15  ;;  %v2591_v28 = vpack.c.bf16 %v129_v27, %v128_v26  ;;  %v2595_v31 = vpack.c.bf16 %v131_v30, %v130_v29  ;;  %v132_v32 = vld [vmem:[#allocation5 + $0x70] sm:$0xff]  ;;  %v133_v33 = vld [vmem:[#allocation5 + $0x78] sm:$0xff]  ;;  %v3005_v42 = vld [vmem:[%s3300_s2] ss:$0 sm:$0xff] }
  0x2d   :  { %2606 = vmatprep.subr.bf16.mxu1 %v2875_v1  ;;  %v2599_v34 = vpack.c.bf16 %v133_v33, %v132_v32 }
  0x2e   :  { %2578 = vmatpush3.bf16.msra.mxu0 %v2575_v9  ;;  %v62_v9 = vld [vmem:[%s3298_s0 + $0x10] sm:$0xff] }
  0x2f   :  { %2580 = vmatprep.subr.bf16.mxu0 %v2579_v14 }
  0x30   :  { %2608 = vmatpush3.bf16.msra.mxu1 %v2979_v21 }
  0x31   :  { %2609 = vmatprep.subr.bf16.mxu1 %v2875_v1 }
  0x32   :  { %2582 = vmatpush3.bf16.msra.mxu0 %v2579_v14  ;;  %v63_v14 = vld [vmem:[%s3298_s0 + $0x18] sm:$0xff] }
  0x33   :  { %2584 = vmatprep.subr.bf16.mxu0 %v2583_v22  ;;  %2373 = vmatmul.mubr.f32.vlgmr.msra.gmra.mrb[0].mxu1 %v2877_v20 }
  0x34   :  { %2611 = vmatpush3.bf16.msra.mxu1 %v2968_v15  ;;  %2383 = vmatprep.mubr.msk.f32.mxu1 %vm2876_vm0, %v2877_v20 }
  0x35   :  { %2612 = vmatprep.subr.bf16.mxu1 %v2875_v1 }
  0x36   :  { %2586 = vmatpush3.bf16.msra.mxu0 %v2583_v22 }
  0x37   :  { %2588 = vmatprep.subr.bf16.mxu0 %v2587_v25 }
  0x38   :  { %2614 = vmatpush3.bf16.msra.mxu1 %v2979_v21 }
  0x39   :  { %2615 = vmatprep.subr.bf16.mxu1 %v2875_v1 }
  0x3a   :  { %2590 = vmatpush3.bf16.msra.mxu0 %v2587_v25 }
  0x3b   :  { %2592 = vmatprep.subr.bf16.mxu0 %v2591_v28 }
  0x3e   :  { %2594 = vmatpush3.bf16.msra.mxu0 %v2591_v28 }
  0x3f   :  { %2596 = vmatprep.subr.bf16.mxu0 %v2595_v31 }
  0x42   :  { %2598 = vmatpush3.bf16.msra.mxu0 %v2595_v31 }
  0x43   :  { %2600 = vmatprep.subr.bf16.mxu0 %v2599_v34 }
  0x46   :  { %2602 = vmatpush3.bf16.msra.mxu0 %v2599_v34 }
  0x47   :  { %2633 = vmatprep.subr.bf16.mxu0 %v2875_v1 }
  0xa6   :  { %v72_v37 = vpop.permute.xlu0 %71 }
  0xa7   :  { %vm94_vm1 = vcmp.eq.s32.totalorder %v72_v37, %v2992_v36 }
  0xa8   :  { %2352 = vmatprep.mubr.msk.f32.mxu0 %vm94_vm1, %v2878_v38 }
  0xaa   :  { %v75_v39 = vpop.permute.xlu0 %74 }
  0xab   :  { %vm95_vm2 = vcmp.eq.s32.totalorder %v75_v39, %v2992_v36 }
  0xac   :  { %2353 = vmatmul.mubr.msk.f32.vlgmr.msra.gmra.mrb[0].mxu0 %vm95_vm2, %v2878_v38 }
  0xad   :  { %2635 = vmatpush3.bf16.msra.mxu0 %v2968_v15 }
  0xae   :  { %2636 = vmatprep.subr.bf16.mxu0 %v2875_v1 }
  0xb1   :  { %2638 = vmatpush3.bf16.msra.mxu0 %v2979_v21 }
  0xb2   :  { %2645 = vmatprep.subr.bf16.mxu0 %v2875_v1 }
 0x106   :  { %v329_v40 = vpop.f32.mrb[0].mxu1 }
 0x107   :  { %v2374_v41 = vpop.f32.mrb[1].mxu1 }
 0x17f   :  { %v2354_v43 = vpop.f32.mrb[0].mxu0 }
 0x180   :  { %v207_v44 = vpop.f32.mrb[1].mxu0  ;;  %v213_v61 = vadd.f32 %v2354_v43, %v3005_v42 }
 0x181   :  { %v208_v45 = vadd.f32 %v3005_v42, %v207_v44 }
 0x183   :  { %v333_v46 = vadd.f32 %v329_v40, %v208_v45 }
 0x185   :  { %2726 = vtanh.f32 %v333_v46  ;;  %v334_v48 = vmul.f32 0.5, %v333_v46 }
 0x187   :  { %2728 = vtanh.f32 %v334_v48 }
 0x18f   :  { %v2727_v47 = vpop.eup %2726 }
 0x190   :  { %341 = vrot.lane.b32.xlu1 %v2727_v47, %s2879_s25 }
 0x191   :  { %v2729_v49 = vpop.eup %2728 }
 0x192   :  { %v336_v50 = vmul.f32 0.5, %v2729_v49 }
 0x194   :  { %v337_v51 = vadd.f32 0.5, %v336_v50 }
 0x196   :  { %v339_v54 = vmul.f32 0.0, %v337_v51 }
 0x202   :  { %v342_v52 = vpop.permute.xlu1 %341 }
 0x203   :  { %v344_v53 = vmul.f32 %v342_v52, %v337_v51 }
 0x205   :  { %346 = vrot.lane.b32.xlu1 %v344_v53, %s2880_s26 }
 0x277   :  { %v347_v55 = vpop.permute.xlu1 %346 }
 0x278   :  { %v349_v56 = vadd.f32 %v347_v55, %v339_v54 }
 0x27a   :  { %2730 = vtanh.f32 %v349_v56 }
 0x284   :  { %v2731_v57 = vpop.eup %2730 }
 0x285   :  { %352 = vrot.lane.b32.xlu0 %v2731_v57, %s2879_s25  ;;  %v64_v57 = vld [vmem:[%s3298_s0 + $0x20] sm:$0xff] }
 0x2f7   :  { %v353_v58 = vpop.permute.xlu0 %352 }
 0x2f8   :  { %v355_v59 = vmul.f32 %v353_v58, %v337_v51 }
 0x2fa   :  { %357 = vrot.lane.b32.xlu1 %v355_v59, %s2880_s26 }
 0x36c   :  { %v358_v60 = vpop.permute.xlu1 %357 }
 0x36d   :  { %360 = vst.msk [vmem:[#allocation3] sm:$0xff] %vm259_vm3, %v358_v60  ;;  %2384 = vmatmul.mubr.msk.f32.vlgmr.msra.gmra.mrb[2].mxu1 %vm259_vm3, %v358_v60 }
 0x36e   :  { %2617 = vmatpush3.bf16.msra.mxu1 %v2968_v15  ;;  %2394 = vmatprep.mubr.msk.f32.mxu1 %vm2876_vm0, %v2877_v20 }
 0x36f   :  { %2618 = vmatprep.subr.bf16.mxu1 %v2875_v1 }
 0x372   :  { %2620 = vmatpush3.bf16.msra.mxu1 %v2979_v21 }
 0x373   :  { %2621 = vmatprep.subr.bf16.mxu1 %v2875_v1 }
 0x440   :  { %v435_v62 = vpop.f32.mrb[2].mxu1 }
 0x441   :  { %v439_v63 = vadd.f32 %v435_v62, %v213_v61  ;;  %v2385_v0 = vpop.f32.mrb[3].mxu1  ;;  %v65_v62 = vld [vmem:[%s3298_s0 + $0x28] sm:$0xff] }
 0x443   :  { %2732 = vtanh.f32 %v439_v63  ;;  %v440_v3 = vmul.f32 0.5, %v439_v63 }
 0x445   :  { %2734 = vtanh.f32 %v440_v3 }
 0x44d   :  { %v2733_v2 = vpop.eup %2732 }
 0x44e   :  { %447 = vrot.lane.b32.xlu0 %v2733_v2, %s2879_s25 }
 0x44f   :  { %v2735_v4 = vpop.eup %2734 }
 0x450   :  { %v442_v5 = vmul.f32 0.5, %v2735_v4 }
 0x452   :  { %v443_v6 = vadd.f32 0.5, %v442_v5 }
 0x454   :  { %v445_v10 = vmul.f32 %v443_v6, %v349_v56 }
 0x4c0   :  { %v448_v7 = vpop.permute.xlu0 %447 }
 0x4c1   :  { %v450_v8 = vmul.f32 %v448_v7, %v443_v6 }
 0x4c3   :  { %452 = vrot.lane.b32.xlu1 %v450_v8, %s2880_s26 }
 0x4c7   :  { %77 = vperm.xlu1 %2725, %v62_v9  }
 0x535   :  { %v453_v11 = vpop.permute.xlu1 %452 }
 0x536   :  { %v455_v12 = vadd.f32 %v453_v11, %v445_v10 }
 0x538   :  { %2736 = vtanh.f32 %v455_v12 }
 0x542   :  { %v2737_v13 = vpop.eup %2736 }
 0x543   :  { %458 = vrot.lane.b32.xlu0 %v2737_v13, %s2879_s25 }
 0x546   :  { %v78_v16 = vpop.permute.xlu1 %77 }
 0x547   :  { %80 = vperm.xlu0 %2724, %v63_v14   ;;  %vm96_vm4 = vcmp.eq.s32.totalorder %v78_v16, %v2992_v36 }
 0x548   :  { %2355 = vmatprep.mubr.msk.f32.mxu0 %vm96_vm4, %v2878_v38 }
 0x5b5   :  { %v459_v17 = vpop.permute.xlu0 %458 }
 0x5b6   :  { %v461_v18 = vmul.f32 %v459_v17, %v443_v6 }
 0x5b8   :  { %463 = vrot.lane.b32.xlu1 %v461_v18, %s2880_s26 }
 0x5c6   :  { %v81_v19 = vpop.permute.xlu0 %80 }
 0x5c7   :  { %vm97_vm5 = vcmp.eq.s32.totalorder %v81_v19, %v2992_v36  ;;  %v66_v19 = vld [vmem:[%s3298_s0 + $0x30] sm:$0xff] }
 0x5c8   :  { %2356 = vmatmul.mubr.msk.f32.gmra.mrb[2].mxu0 %vm97_vm5, %v2878_v38 }
 0x62a   :  { %v464_v22 = vpop.permute.xlu1 %463 }
 0x62b   :  { %467 = vst.msk [vmem:[#allocation3 + $0x8] sm:$0xff] %vm259_vm3, %v464_v22  ;;  %2395 = vmatmul.mubr.msk.f32.vlgmr.msra.gmra.mrb[4].mxu1 %vm259_vm3, %v464_v22 }
 0x62c   :  { %2623 = vmatpush3.bf16.msra.mxu1 %v2968_v15  ;;  %2405 = vmatprep.mubr.msk.f32.mxu1 %vm2876_vm0, %v2877_v20 }
 0x62d   :  { %2624 = vmatprep.subr.bf16.mxu1 %v2875_v1 }
 0x630   :  { %2626 = vmatpush3.bf16.msra.mxu1 %v2979_v21 }
 0x631   :  { %2627 = vmatprep.subr.bf16.mxu1 %v2875_v1 }
 0x69b   :  { %v2357_v23 = vpop.f32.mrb[2].mxu0 }
 0x69c   :  { %v217_v24 = vpop.f32.mrb[3].mxu0  ;;  %v223_v46 = vadd.f32 %v2357_v23, %v3005_v42 }
 0x69d   :  { %v218_v25 = vadd.f32 %v3005_v42, %v217_v24 }
 0x6fe   :  { %v542_v26 = vpop.f32.mrb[4].mxu1 }
 0x6ff   :  { %v546_v27 = vadd.f32 %v542_v26, %v218_v25  ;;  %v2396_v28 = vpop.f32.mrb[5].mxu1  ;;  %v67_v26 = vld [vmem:[%s3298_s0 + $0x38] sm:$0xff] }
 0x701   :  { %2738 = vtanh.f32 %v546_v27  ;;  %v547_v30 = vmul.f32 0.5, %v546_v27 }
 0x703   :  { %2740 = vtanh.f32 %v547_v30 }
 0x70b   :  { %v2739_v29 = vpop.eup %2738 }
 0x70c   :  { %554 = vrot.lane.b32.xlu0 %v2739_v29, %s2879_s25 }
 0x70d   :  { %v2741_v31 = vpop.eup %2740 }
 0x70e   :  { %v549_v32 = vmul.f32 0.5, %v2741_v31 }
 0x710   :  { %v550_v33 = vadd.f32 0.5, %v549_v32 }
 0x712   :  { %v552_v37 = vmul.f32 %v550_v33, %v455_v12 }
 0x77e   :  { %v555_v34 = vpop.permute.xlu0 %554 }
 0x77f   :  { %v557_v35 = vmul.f32 %v555_v34, %v550_v33 }
 0x781   :  { %559 = vrot.lane.b32.xlu1 %v557_v35, %s2880_s26 }
 0x7f3   :  { %v560_v39 = vpop.permute.xlu1 %559 }
 0x7f4   :  { %v562_v40 = vadd.f32 %v560_v39, %v552_v37 }
 0x7f6   :  { %2742 = vtanh.f32 %v562_v40 }
 0x800   :  { %v2743_v41 = vpop.eup %2742 }
 0x801   :  { %565 = vrot.lane.b32.xlu0 %v2743_v41, %s2879_s25 }
 0x873   :  { %v566_v43 = vpop.permute.xlu0 %565 }
 0x874   :  { %v568_v44 = vmul.f32 %v566_v43, %v550_v33 }
 0x876   :  { %570 = vrot.lane.b32.xlu1 %v568_v44, %s2880_s26 }
 0x8e8   :  { %v571_v45 = vpop.permute.xlu1 %570 }
 0x8e9   :  { %574 = vst.msk [vmem:[#allocation3 + $0x10] sm:$0xff] %vm259_vm3, %v571_v45  ;;  %2406 = vmatmul.mubr.msk.f32.vlgmr.msra.gmra.mrb[6].mxu1 %vm259_vm3, %v571_v45 }
 0x8ea   :  { %2629 = vmatpush3.bf16.msra.mxu1 %v2968_v15  ;;  %2416 = vmatprep.mubr.msk.f32.mxu1 %vm2876_vm0, %v2877_v20 }
 0x8eb   :  { %2630 = vmatprep.subr.bf16.mxu1 %v2875_v1 }
 0x8ee   :  { %2632 = vmatpush3.bf16.msra.mxu1 %v2979_v21 }
 0x8ef   :  { %2639 = vmatprep.subr.bf16.mxu1 %v2875_v1 }
 0x9bc   :  { %v649_v47 = vpop.f32.mrb[6].mxu1 }
 0x9bd   :  { %v653_v48 = vadd.f32 %v649_v47, %v223_v46  ;;  %v2407_v49 = vpop.f32.mrb[7].mxu1  ;;  %v1118_v47 = vld [vmem:[%s3302_s4] sm:$0xff] }
 0x9bf   :  { %2744 = vtanh.f32 %v653_v48  ;;  %v654_v51 = vmul.f32 0.5, %v653_v48  ;;  %v1119_v48 = vld [vmem:[%s3302_s4 + $0x8] sm:$0xff] }
 0x9c0   :  { %v2651_v49 = vpack.c.bf16 %v1119_v48, %v1118_v47 }
 0x9c1   :  { %2746 = vtanh.f32 %v654_v51 }
 0x9c9   :  { %v2745_v50 = vpop.eup %2744 }
 0x9ca   :  { %661 = vrot.lane.b32.xlu0 %v2745_v50, %s2879_s25 }
 0x9cb   :  { %v2747_v52 = vpop.eup %2746 }
 0x9cc   :  { %v656_v53 = vmul.f32 0.5, %v2747_v52 }
 0x9ce   :  { %v657_v54 = vadd.f32 0.5, %v656_v53  ;;  %v1120_v53 = vld [vmem:[%s3302_s4 + $0x10] sm:$0xff] }
 0x9d0   :  { %v659_v58 = vmul.f32 %v657_v54, %v562_v40 }
 0xa3c   :  { %v662_v55 = vpop.permute.xlu0 %661 }
 0xa3d   :  { %v664_v56 = vmul.f32 %v662_v55, %v657_v54 }
 0xa3f   :  { %666 = vrot.lane.b32.xlu1 %v664_v56, %s2880_s26 }
 0xa43   :  { %83 = vperm.xlu1 %2725, %v64_v57   ;;  %v1110_v57 = vld [vmem:[#allocation3] sm:$0xff] }
 0xab1   :  { %v667_v59 = vpop.permute.xlu1 %666 }
 0xab2   :  { %v669_v60 = vadd.f32 %v667_v59, %v659_v58  ;;  %v1111_v58 = vld [vmem:[#allocation3 + $0x8] sm:$0xff]  ;;  %v1112_v59 = vld [vmem:[#allocation3 + $0x10] sm:$0xff] }
 0xab4   :  { %2748 = vtanh.f32 %v669_v60 }
 0xabe   :  { %v2749_v61 = vpop.eup %2748 }
 0xabf   :  { %672 = vrot.lane.b32.xlu0 %v2749_v61, %s2879_s25 }
 0xac2   :  { %v84_v63 = vpop.permute.xlu1 %83 }
 0xac3   :  { %vm98_vm6 = vcmp.eq.s32.totalorder %v84_v63, %v2992_v36  ;;  %86 = vperm.xlu0 %2724, %v65_v62  }
 0xac4   :  { %2358 = vmatprep.mubr.msk.f32.mxu0 %vm98_vm6, %v2878_v38 }
 0xb31   :  { %v673_v0 = vpop.permute.xlu0 %672 }
 0xb32   :  { %v675_v2 = vmul.f32 %v673_v0, %v657_v54  ;;  %v1121_v54 = vld [vmem:[%s3302_s4 + $0x18] sm:$0xff] }
 0xb33   :  { %v2655_v55 = vpack.c.bf16 %v1121_v54, %v1120_v53 }
 0xb34   :  { %677 = vrot.lane.b32.xlu1 %v675_v2, %s2880_s26 }
 0xb42   :  { %v87_v3 = vpop.permute.xlu0 %86 }
 0xb43   :  { %vm99_vm7 = vcmp.eq.s32.totalorder %v87_v3, %v2992_v36 }
 0xb44   :  { %2359 = vmatmul.mubr.msk.f32.gmra.mrb[4].mxu0 %vm99_vm7, %v2878_v38 }
 0xba6   :  { %v678_v4 = vpop.permute.xlu1 %677 }
 0xba7   :  { %681 = vst.msk [vmem:[#allocation3 + $0x18] sm:$0xff] %vm259_vm3, %v678_v4  ;;  %2417 = vmatmul.mubr.msk.f32.vlgmr.msra.gmra.mrb[8].mxu1 %vm259_vm3, %v678_v4 }
 0xba8   :  { %2641 = vmatpush3.bf16.msra.mxu1 %v2968_v15  ;;  %2438 = vmatprep.mubr.msk.f32.mxu1 %vm2876_vm0, %v2877_v20 }
 0xba9   :  { %2642 = vmatprep.subr.bf16.mxu1 %v2875_v1 }
 0xbac   :  { %2644 = vmatpush3.bf16.msra.mxu1 %v2979_v21 }
 0xbad   :  { %2652 = vmatprep.subr.bf16.mxu1 %v2651_v49 }
 0xc17   :  { %v2360_v5 = vpop.f32.mrb[4].mxu0 }
 0xc18   :  { %v227_v6 = vpop.f32.mrb[5].mxu0  ;;  %v233_v32 = vadd.f32 %v2360_v5, %v3005_v42 }
 0xc19   :  { %v228_v7 = vadd.f32 %v3005_v42, %v227_v6 }
 0xc7a   :  { %v756_v8 = vpop.f32.mrb[8].mxu1 }
 0xc7b   :  { %v760_v9 = vadd.f32 %v756_v8, %v228_v7  ;;  %v2418_v10 = vpop.f32.mrb[9].mxu1 }
 0xc7d   :  { %2750 = vtanh.f32 %v760_v9  ;;  %v761_v12 = vmul.f32 0.5, %v760_v9 }
 0xc7f   :  { %2752 = vtanh.f32 %v761_v12 }
 0xc87   :  { %v2751_v11 = vpop.eup %2750 }
 0xc88   :  { %768 = vrot.lane.b32.xlu0 %v2751_v11, %s2879_s25 }
 0xc89   :  { %v2753_v13 = vpop.eup %2752 }
 0xc8a   :  { %v763_v14 = vmul.f32 0.5, %v2753_v13 }
 0xc8c   :  { %v764_v16 = vadd.f32 0.5, %v763_v14 }
 0xc8e   :  { %v766_v22 = vmul.f32 %v764_v16, %v669_v60  ;;  %v1113_v60 = vld [vmem:[#allocation3 + $0x18] sm:$0xff] }
 0xcfa   :  { %v769_v17 = vpop.permute.xlu0 %768 }
 0xcfb   :  { %v771_v18 = vmul.f32 %v769_v17, %v764_v16 }
 0xcfd   :  { %773 = vrot.lane.b32.xlu1 %v771_v18, %s2880_s26 }
 0xd01   :  { %89 = vperm.xlu1 %2725, %v66_v19  }
 0xd6f   :  { %v774_v23 = vpop.permute.xlu1 %773 }
 0xd70   :  { %v776_v24 = vadd.f32 %v774_v23, %v766_v22 }
 0xd72   :  { %2754 = vtanh.f32 %v776_v24 }
 0xd7c   :  { %v2755_v25 = vpop.eup %2754 }
 0xd7d   :  { %779 = vrot.lane.b32.xlu0 %v2755_v25, %s2879_s25  ;;  %v1268_v25 = vld [vmem:[%s3303_s5 + $0x8] sm:$0xff] }
 0xd80   :  { %v90_v27 = vpop.permute.xlu1 %89 }
 0xd81   :  { %vm100_vm8 = vcmp.eq.s32.totalorder %v90_v27, %v2992_v36  ;;  %92 = vperm.xlu0 %2724, %v67_v26   ;;  %v1269_v27 = vld [vmem:[%s3303_s5 + $0x10] sm:$0xff] }
 0xd82   :  { %2361 = vmatprep.mubr.msk.f32.mxu0 %vm100_vm8, %v2878_v38 }
 0xdef   :  { %v780_v28 = vpop.permute.xlu0 %779 }
 0xdf0   :  { %v782_v29 = vmul.f32 %v780_v28, %v764_v16  ;;  %v1270_v28 = vld [vmem:[%s3303_s5 + $0x18] sm:$0xff] }
 0xdf2   :  { %784 = vrot.lane.b32.xlu1 %v782_v29, %s2880_s26  ;;  %v3164_v29 = vpack.c.bf16 %v1270_v28, %v1269_v27 }
 0xe00   :  { %v93_v30 = vpop.permute.xlu0 %92 }
 0xe01   :  { %vm101_vm9 = vcmp.eq.s32.totalorder %v93_v30, %v2992_v36 }
 0xe02   :  { %2362 = vmatmul.mubr.msk.f32.gmra.mrb[6].mxu0 %vm101_vm9, %v2878_v38 }
 0xe03   :  { %2427 = vmatprep.mubr.msk.f32.mxu0 %vm2876_vm0, %v2877_v20 }
 0xe64   :  { %v785_v31 = vpop.permute.xlu1 %784 }
 0xe65   :  { %788 = vst.msk [vmem:[#allocation3 + $0x20] sm:$0xff] %vm259_vm3, %v785_v31  ;;  %2428 = vmatmul.mubr.msk.f32.vlgmr.msra.gmra.mrb[8].mxu0 %vm259_vm3, %v785_v31 }
 0xe66   :  { %2647 = vmatpush3.bf16.msra.mxu0 %v2968_v15  ;;  %2449 = vmatprep.mubr.msk.f32.mxu0 %vm2876_vm0, %v2877_v20 }
 0xe67   :  { %2648 = vmatprep.subr.bf16.mxu0 %v2875_v1 }
 0xe6a   :  { %2650 = vmatpush3.bf16.msra.mxu0 %v2979_v21 }
 0xe6b   :  { %2659 = vmatprep.subr.bf16.mxu0 %v2875_v1 }
 0xe6c   :  { %v1114_v61 = vld [vmem:[#allocation3 + $0x20] sm:$0xff] }
 0xed5   :  { %v3103_v36 = vpop.f32.mrb[6].mxu0 }
 0xed6   :  { %v237_v38 = vpop.f32.mrb[7].mxu0 }
 0xed7   :  { %v238_v63 = vadd.f32 %v3005_v42, %v237_v38 }
 0xf38   :  { %v863_v33 = vpop.f32.mrb[8].mxu0 }
 0xf39   :  { %v867_v34 = vadd.f32 %v863_v33, %v233_v32  ;;  %v2429_v35 = vpop.f32.mrb[9].mxu0  ;;  %v243_v33 = vadd.f32 %v3103_v36, %v3005_v42 }
 0xf3b   :  { %2756 = vtanh.f32 %v867_v34  ;;  %v868_v15 = vmul.f32 0.5, %v867_v34 }
 0xf3d   :  { %2758 = vtanh.f32 %v868_v15  ;;  %v3190_v15 = vld [vmem:[%s3304_s6] ss:$0 sm:$0xff] }
 0xf45   :  { %v2757_v37 = vpop.eup %2756 }
 0xf46   :  { %875 = vrot.lane.b32.xlu0 %v2757_v37, %s2879_s25 }
 0xf47   :  { %v2759_v39 = vpop.eup %2758 }
 0xf48   :  { %v870_v40 = vmul.f32 0.5, %v2759_v39 }
 0xf4a   :  { %v871_v41 = vadd.f32 0.5, %v870_v40 }
 0xf4c   :  { %v873_v44 = vmul.f32 %v871_v41, %v776_v24  ;;  %v1267_v24 = vld [vmem:[%s3303_s5] sm:$0xff] }
 0xf4d   :  { %v3154_v26 = vpack.c.bf16 %v1268_v25, %v1267_v24 }
 0xfb8   :  { %v876_v21 = vpop.permute.xlu0 %875 }
 0xfb9   :  { %v878_v43 = vmul.f32 %v876_v21, %v871_v41 }
 0xfbb   :  { %880 = vrot.lane.b32.xlu1 %v878_v43, %s2880_s26 }
0x102d   :  { %v881_v45 = vpop.permute.xlu1 %880 }
0x102e   :  { %v883_v46 = vadd.f32 %v881_v45, %v873_v44 }
0x1030   :  { %2760 = vtanh.f32 %v883_v46 }
0x103a   :  { %v2761_v50 = vpop.eup %2760 }
0x103b   :  { %886 = vrot.lane.b32.xlu0 %v2761_v50, %s2879_s25 }
0x10ad   :  { %v887_v51 = vpop.permute.xlu0 %886 }
0x10ae   :  { %v889_v52 = vmul.f32 %v887_v51, %v871_v41 }
0x10b0   :  { %891 = vrot.lane.b32.xlu1 %v889_v52, %s2880_s26 }
0x1122   :  { %v892_v56 = vpop.permute.xlu1 %891 }
0x1123   :  { %895 = vst.msk [vmem:[#allocation3 + $0x28] sm:$0xff] %vm259_vm3, %v892_v56  ;;  %2439 = vmatmul.mubr.msk.f32.vlgmr.msra.gmra.mrb[10].mxu1 %vm259_vm3, %v892_v56 }
0x1124   :  { %2654 = vmatpush3.bf16.msra.mxu1 %v2651_v49  ;;  %2460 = vmatprep.mubr.msk.f32.mxu1 %vm259_vm3, %v1110_v57 }
0x1125   :  { %2656 = vmatprep.subr.bf16.mxu1 %v2655_v55 }
0x1128   :  { %2658 = vmatpush3.bf16.msra.mxu1 %v2655_v55 }
0x1129   :  { %2671 = vmatprep.subr.bf16.mxu1 %v2875_v1 }
0x112a   :  { %v1115_v62 = vld [vmem:[#allocation3 + $0x28] sm:$0xff] }
0x112b   :  { %2461 = vmatmul.mubr.msk.f32.vlgmr.msra.gmra.mrb[12].mxu1 %vm259_vm3, %v1111_v58 }
0x112c   :  { %2463 = vmatprep.mubr.msk.f32.mxu1 %vm259_vm3, %v1112_v59  ;;  %2673 = vmatpush3.bf16.msra.mxu1 %v3154_v26 }
0x112d   :  { %2674 = vmatprep.subr.bf16.mxu1 %v2875_v1 }
0x112f   :  { %2464 = vmatmul.mubr.msk.f32.gmra.mrb[14].mxu1 %vm259_vm3, %v1113_v60 }
0x1130   :  { %2466 = vmatprep.mubr.msk.f32.mxu1 %vm259_vm3, %v1114_v61  ;;  %2676 = vmatpush3.bf16.msra.mxu1 %v3164_v29 }
0x1131   :  { %2683 = vmatprep.subr.bf16.mxu1 %v2875_v1 }
0x1133   :  { %2467 = vmatmul.mubr.msk.f32.gmra.mrb[16].mxu1 %vm259_vm3, %v1115_v62 }
0x11f6   :  { %v970_v0 = vpop.f32.mrb[10].mxu1 }
0x11f7   :  { %v974_v2 = vadd.f32 %v970_v0, %v238_v63  ;;  %v2440_v3 = vpop.f32.mrb[11].mxu1 }
0x11f9   :  { %2762 = vtanh.f32 %v974_v2  ;;  %v975_v11 = vmul.f32 0.5, %v974_v2 }
0x11fb   :  { %2764 = vtanh.f32 %v975_v11 }
0x11fe   :  { %v3132_v4 = vpop.f32.mrb[12].mxu1 }
0x11ff   :  { %v1219_v5 = vpop.f32.mrb[13].mxu1 }
0x1200   :  { %v1220_v39 = vadd.f32 %v3190_v15, %v1219_v5 }
0x1202   :  { %v3134_v6 = vpop.f32.mrb[14].mxu1 }
0x1203   :  { %v2763_v7 = vpop.eup %2762  ;;  %v3136_v8 = vpop.f32.mrb[15].mxu1 }
0x1204   :  { %982 = vrot.lane.b32.xlu0 %v2763_v7, %s2879_s25  ;;  %v1225_v7 = vadd.f32 %v3132_v4, %v3190_v15 }
0x1205   :  { %v2765_v12 = vpop.eup %2764 }
0x1206   :  { %v3139_v9 = vpop.f32.mrb[16].mxu1  ;;  %v977_v13 = vmul.f32 0.5, %v2765_v12 }
0x1207   :  { %v3141_v10 = vpop.f32.mrb[17].mxu1 }
0x1208   :  { %v978_v14 = vadd.f32 0.5, %v977_v13 }
0x120a   :  { %v980_v18 = vmul.f32 %v978_v14, %v883_v46 }
0x1276   :  { %v983_v16 = vpop.permute.xlu0 %982 }
0x1277   :  { %v985_v17 = vmul.f32 %v983_v16, %v978_v14 }
0x1279   :  { %987 = vrot.lane.b32.xlu1 %v985_v17, %s2880_s26 }
0x12eb   :  { %v988_v19 = vpop.permute.xlu1 %987 }
0x12ec   :  { %v3144_v22 = vadd.f32 %v988_v19, %v980_v18 }
0x12ee   :  { %2766 = vtanh.f32 %v3144_v22 }
0x12f8   :  { %v2767_v23 = vpop.eup %2766 }
0x12f9   :  { %993 = vrot.lane.b32.xlu0 %v2767_v23, %s2879_s25 }
0x136b   :  { %v994_v30 = vpop.permute.xlu0 %993 }
0x136c   :  { %v996_v31 = vmul.f32 %v994_v30, %v978_v14 }
0x136e   :  { %998 = vrot.lane.b32.xlu1 %v996_v31, %s2880_s26 }
0x13e0   :  { %v999_v38 = vpop.permute.xlu1 %998 }
0x13e1   :  { %1002 = vst.msk [vmem:[#allocation3 + $0x30] sm:$0xff] %vm259_vm3, %v999_v38  ;;  %2450 = vmatmul.mubr.msk.f32.vlgmr.msra.gmra.mrb[10].mxu0 %vm259_vm3, %v999_v38 }
0x13e2   :  { %2661 = vmatpush3.bf16.msra.mxu0 %v3154_v26  ;;  %2480 = vmatprep.mubr.msk.f32.mxu0 %vm2876_vm0, %v2877_v20 }
0x13e3   :  { %2662 = vmatprep.subr.bf16.mxu0 %v2875_v1 }
0x13e6   :  { %2664 = vmatpush3.bf16.msra.mxu0 %v3164_v29 }
0x13e7   :  { %2665 = vmatprep.subr.bf16.mxu0 %v2875_v1 }
0x13e8   :  { %v1116_v32 = vld [vmem:[#allocation3 + $0x30] sm:$0xff] }
0x13e9   :  { %2481 = vmatmul.mubr.f32.vlgmr.msra.gmra.mrb[12].mxu0 %v2877_v20  ;;  %2469 = vmatprep.mubr.msk.f32.mxu1 %vm259_vm3, %v1116_v32 }
0x13ea   :  { %2667 = vmatpush3.bf16.msra.mxu0 %v3154_v26  ;;  %2491 = vmatprep.mubr.msk.f32.mxu0 %vm2876_vm0, %v2877_v20 }
0x13eb   :  { %2668 = vmatprep.subr.bf16.mxu0 %v2875_v1 }
0x13ee   :  { %2670 = vmatpush3.bf16.msra.mxu0 %v3164_v29 }
0x13ef   :  { %2677 = vmatprep.subr.bf16.mxu0 %v2875_v1 }
0x14b4   :  { %v1077_v34 = vpop.f32.mrb[10].mxu0 }
0x14b5   :  { %v1081_v35 = vadd.f32 %v1077_v34, %v243_v33  ;;  %v2451_v37 = vpop.f32.mrb[11].mxu0 }
0x14b7   :  { %v1082_v53 = vmul.f32 0.5, %v1081_v35 }
0x14bc   :  { %v1337_v40 = vpop.f32.mrb[12].mxu0 }
0x14bd   :  { %v1341_v41 = vadd.f32 %v1337_v40, %v1220_v39  ;;  %v2482_v21 = vpop.f32.mrb[13].mxu0 }
0x14bf   :  { %2768 = vtanh.f32 %v1341_v41  ;;  %v1342_v44 = vmul.f32 0.5, %v1341_v41 }
0x14c1   :  { %2770 = vtanh.f32 %v1342_v44 }
0x14c9   :  { %v2769_v43 = vpop.eup %2768 }
0x14ca   :  { %1349 = vrot.lane.b32.xlu0 %v2769_v43, %s2879_s25 }
0x14cb   :  { %v2771_v42 = vpop.eup %2770 }
0x14cc   :  { %v1344_v36 = vmul.f32 0.5, %v2771_v42 }
0x14ce   :  { %v1345_v45 = vadd.f32 0.5, %v1344_v36 }
0x14d0   :  { %v1347_v48 = vmul.f32 0.0, %v1345_v45 }
0x153c   :  { %v1350_v46 = vpop.permute.xlu0 %1349 }
0x153d   :  { %v1352_v47 = vmul.f32 %v1350_v46, %v1345_v45 }
0x153f   :  { %1354 = vrot.lane.b32.xlu1 %v1352_v47, %s2880_s26 }
0x15b1   :  { %v1355_v49 = vpop.permute.xlu1 %1354 }
0x15b2   :  { %v1357_v50 = vadd.f32 %v1355_v49, %v1347_v48 }
0x15b4   :  { %2772 = vtanh.f32 %v1357_v50 }
0x15b5   :  { %2774 = vtanh.f32 %v1081_v35  ;;  %v1230_v35 = vadd.f32 %v3190_v15, %v3136_v8 }
0x15b6   :  { %2776 = vtanh.f32 %v1082_v53 }
0x15be   :  { %v2773_v51 = vpop.eup %2772 }
0x15bf   :  { %1360 = vrot.lane.b32.xlu0 %v2773_v51, %s2879_s25  ;;  %v2775_v52 = vpop.eup %2774 }
0x15c0   :  { %v2777_v54 = vpop.eup %2776 }
0x15c1   :  { %v1084_v55 = vmul.f32 0.5, %v2777_v54 }
0x15c3   :  { %1089 = vrot.lane.b32.xlu0 %v2775_v52, %s2879_s25  ;;  %v1085_v58 = vadd.f32 0.5, %v1084_v55  ;;  %v1235_v52 = vadd.f32 %v3134_v6, %v3190_v15 }
0x15c5   :  { %v1087_v62 = vmul.f32 %v1085_v58, %v3144_v22 }
0x1631   :  { %v1361_v56 = vpop.permute.xlu0 %1360 }
0x1632   :  { %v1363_v57 = vmul.f32 %v1361_v56, %v1345_v45 }
0x1634   :  { %1367 = vrot.lane.b32.xlu1 %v1363_v57, %s2880_s26 }
0x1635   :  { %v1090_v59 = vpop.permute.xlu0 %1089 }
0x1636   :  { %v1092_v60 = vmul.f32 %v1090_v59, %v1085_v58 }
0x1638   :  { %1094 = vrot.lane.b32.xlu0 %v1092_v60, %s2880_s26 }
0x16a6   :  { %v1368_v61 = vpop.permute.xlu1 %1367 }
0x16a7   :  { %2492 = vmatmul.mubr.msk.f32.vlgmr.msra.gmra.mrb[14].mxu0 %vm259_vm3, %v1368_v61 }
0x16a8   :  { %2679 = vmatpush3.bf16.msra.mxu0 %v3154_v26  ;;  %2513 = vmatprep.mubr.msk.f32.mxu0 %vm2876_vm0, %v2877_v20 }
0x16a9   :  { %2680 = vmatprep.subr.bf16.mxu0 %v2875_v1 }
0x16aa   :  { %v1095_v63 = vpop.permute.xlu0 %1094 }
0x16ab   :  { %v1097_v0 = vadd.f32 %v1095_v63, %v1087_v62 }
0x16ac   :  { %2682 = vmatpush3.bf16.msra.mxu0 %v3164_v29 }
0x16ad   :  { %2778 = vtanh.f32 %v1097_v0  ;;  %2689 = vmatprep.subr.bf16.mxu0 %v2875_v1 }
0x16b7   :  { %v2779_v2 = vpop.eup %2778 }
0x16b8   :  { %1100 = vrot.lane.b32.xlu0 %v2779_v2, %s2879_s25 }
0x172a   :  { %v1101_v3 = vpop.permute.xlu0 %1100 }
0x172b   :  { %v1103_v5 = vmul.f32 %v1101_v3, %v1085_v58 }
0x172d   :  { %1105 = vrot.lane.b32.xlu0 %v1103_v5, %s2880_s26 }
0x177a   :  { %v1437_v11 = vpop.f32.mrb[14].mxu0 }
0x177b   :  { %v1441_v12 = vadd.f32 %v1437_v11, %v1225_v7  ;;  %v2493_v13 = vpop.f32.mrb[15].mxu0  ;;  %v1240_v11 = vadd.f32 %v3190_v15, %v3141_v10 }
0x177d   :  { %2780 = vtanh.f32 %v1441_v12  ;;  %v1442_v18 = vmul.f32 0.5, %v1441_v12 }
0x177f   :  { %2782 = vtanh.f32 %v1442_v18 }
0x1787   :  { %v2781_v14 = vpop.eup %2780 }
0x1788   :  { %1449 = vrot.lane.b32.xlu1 %v2781_v14, %s2879_s25 }
0x1789   :  { %v2783_v19 = vpop.eup %2782 }
0x178a   :  { %v1444_v4 = vmul.f32 0.5, %v2783_v19 }
0x178c   :  { %v1445_v22 = vadd.f32 0.5, %v1444_v4 }
0x178e   :  { %v1447_v25 = vmul.f32 %v1445_v22, %v1357_v50 }
0x179f   :  { %v1106_v16 = vpop.permute.xlu0 %1105 }
0x17a0   :  { %1109 = vst.msk [vmem:[#allocation3 + $0x38] sm:$0xff] %vm259_vm3, %v1106_v16 }
0x17a7   :  { %v1117_v17 = vld [vmem:[#allocation3 + $0x38] sm:$0xff] }
0x17a8   :  { %2470 = vmatmul.mubr.msk.f32.gmra.mrb[18].mxu1 %vm259_vm3, %v1117_v17 }
0x17a9   :  { %2502 = vmatprep.mubr.msk.f32.mxu1 %vm2876_vm0, %v2877_v20 }
0x17fa   :  { %v1450_v23 = vpop.permute.xlu1 %1449 }
0x17fb   :  { %v1452_v24 = vmul.f32 %v1450_v23, %v1445_v22 }
0x17fd   :  { %1454 = vrot.lane.b32.xlu1 %v1452_v24, %s2880_s26 }
0x186f   :  { %v1455_v27 = vpop.permute.xlu1 %1454 }
0x1870   :  { %v1457_v28 = vadd.f32 %v1455_v27, %v1447_v25 }
0x1872   :  { %2784 = vtanh.f32 %v1457_v28 }
0x187b   :  { %v3217_v30 = vpop.f32.mrb[18].mxu1 }
0x187c   :  { %v2785_v31 = vpop.eup %2784  ;;  %v3219_v38 = vpop.f32.mrb[19].mxu1 }
0x187d   :  { %1460 = vrot.lane.b32.xlu1 %v2785_v31, %s2879_s25 }
0x18ef   :  { %v1461_v32 = vpop.permute.xlu1 %1460 }
0x18f0   :  { %v1463_v33 = vmul.f32 %v1461_v32, %v1445_v22 }
0x18f2   :  { %1467 = vrot.lane.b32.xlu1 %v1463_v33, %s2880_s26  ;;  %v1245_v33 = vadd.f32 %v3139_v9, %v3190_v15 }
0x1964   :  { %v1468_v34 = vpop.permute.xlu1 %1467 }
0x1965   :  { %2503 = vmatmul.mubr.msk.f32.vlgmr.msra.gmra.mrb[20].mxu1 %vm259_vm3, %v1468_v34 }
0x1966   :  { %2685 = vmatpush3.bf16.msra.mxu1 %v3154_v26  ;;  %2524 = vmatprep.mubr.msk.f32.mxu1 %vm2876_vm0, %v2877_v20 }
0x1967   :  { %2686 = vmatprep.subr.bf16.mxu1 %v2875_v1 }
0x196a   :  { %2688 = vmatpush3.bf16.msra.mxu1 %v3164_v29 }
0x196b   :  { %2695 = vmatprep.subr.bf16.mxu1 %v2875_v1 }
0x1a38   :  { %v1537_v37 = vpop.f32.mrb[20].mxu1 }
0x1a39   :  { %v1541_v39 = vadd.f32 %v1537_v37, %v1230_v35  ;;  %v2504_v40 = vpop.f32.mrb[21].mxu1 }
0x1a3b   :  { %2786 = vtanh.f32 %v1541_v39  ;;  %v1542_v21 = vmul.f32 0.5, %v1541_v39 }
0x1a3d   :  { %2788 = vtanh.f32 %v1542_v21 }
0x1a45   :  { %v2787_v41 = vpop.eup %2786 }
0x1a46   :  { %1549 = vrot.lane.b32.xlu0 %v2787_v41, %s2879_s25 }
0x1a47   :  { %v2789_v43 = vpop.eup %2788 }
0x1a48   :  { %v1544_v44 = vmul.f32 0.5, %v2789_v43 }
0x1a4a   :  { %v1545_v42 = vadd.f32 0.5, %v1544_v44 }
0x1a4c   :  { %v1547_v46 = vmul.f32 %v1545_v42, %v1457_v28 }
0x1ab8   :  { %v1550_v36 = vpop.permute.xlu0 %1549 }
0x1ab9   :  { %v1552_v45 = vmul.f32 %v1550_v36, %v1545_v42 }
0x1abb   :  { %1554 = vrot.lane.b32.xlu1 %v1552_v45, %s2880_s26 }
0x1b2d   :  { %v1555_v47 = vpop.permute.xlu1 %1554 }
0x1b2e   :  { %v1557_v48 = vadd.f32 %v1555_v47, %v1547_v46 }
0x1b30   :  { %2790 = vtanh.f32 %v1557_v48 }
0x1b3a   :  { %v2791_v8 = vpop.eup %2790 }
0x1b3b   :  { %1560 = vrot.lane.b32.xlu0 %v2791_v8, %s2879_s25 }
0x1bad   :  { %v1561_v49 = vpop.permute.xlu0 %1560 }
0x1bae   :  { %v1563_v50 = vmul.f32 %v1561_v49, %v1545_v42 }
0x1bb0   :  { %1567 = vrot.lane.b32.xlu1 %v1563_v50, %s2880_s26 }
0x1c22   :  { %v1568_v51 = vpop.permute.xlu1 %1567 }
0x1c23   :  { %2514 = vmatmul.mubr.msk.f32.vlgmr.msra.gmra.mrb[16].mxu0 %vm259_vm3, %v1568_v51 }
0x1c24   :  { %2691 = vmatpush3.bf16.msra.mxu0 %v3154_v26  ;;  %2535 = vmatprep.mubr.msk.f32.mxu0 %vm2876_vm0, %v2877_v20 }
0x1c25   :  { %2692 = vmatprep.subr.bf16.mxu0 %v2875_v1 }
0x1c28   :  { %2694 = vmatpush3.bf16.msra.mxu0 %v3164_v29 }
0x1c29   :  { %2701 = vmatprep.subr.bf16.mxu0 %v2875_v1 }
0x1cf6   :  { %v1637_v53 = vpop.f32.mrb[16].mxu0 }
0x1cf7   :  { %v1641_v54 = vadd.f32 %v1637_v53, %v1235_v52  ;;  %v2515_v55 = vpop.f32.mrb[17].mxu0 }
0x1cf9   :  { %2792 = vtanh.f32 %v1641_v54  ;;  %v1642_v57 = vmul.f32 0.5, %v1641_v54 }
0x1cfb   :  { %2794 = vtanh.f32 %v1642_v57 }
0x1d03   :  { %v2793_v56 = vpop.eup %2792 }
0x1d04   :  { %1649 = vrot.lane.b32.xlu0 %v2793_v56, %s2879_s25 }
0x1d05   :  { %v2795_v58 = vpop.eup %2794 }
0x1d06   :  { %v1644_v59 = vmul.f32 0.5, %v2795_v58 }
0x1d08   :  { %v1645_v60 = vadd.f32 0.5, %v1644_v59 }
0x1d0a   :  { %v1647_v63 = vmul.f32 %v1645_v60, %v1557_v48  ;;  %v1250_v48 = vadd.f32 %v3190_v15, %v3219_v38 }
0x1d76   :  { %v1650_v61 = vpop.permute.xlu0 %1649 }
0x1d77   :  { %v1652_v62 = vmul.f32 %v1650_v61, %v1645_v60 }
0x1d79   :  { %1654 = vrot.lane.b32.xlu1 %v1652_v62, %s2880_s26 }
0x1deb   :  { %v1655_v0 = vpop.permute.xlu1 %1654 }
0x1dec   :  { %v1657_v2 = vadd.f32 %v1655_v0, %v1647_v63  ;;  %v1255_v63 = vadd.f32 %v3217_v30, %v3190_v15  ;;  %v2064_v15 = vld [vmem:[#allocation7] sm:$0xff]  ;;  %v2065_v30 = vld [vmem:[#allocation7 + $0x8] sm:$0xff] }
0x1dee   :  { %2796 = vtanh.f32 %v1657_v2 }
0x1df8   :  { %v2797_v6 = vpop.eup %2796 }
0x1df9   :  { %1660 = vrot.lane.b32.xlu0 %v2797_v6, %s2879_s25 }
0x1e6b   :  { %v1661_v3 = vpop.permute.xlu0 %1660 }
0x1e6c   :  { %v1663_v5 = vmul.f32 %v1661_v3, %v1645_v60 }
0x1e6e   :  { %1667 = vrot.lane.b32.xlu1 %v1663_v5, %s2880_s26 }
0x1ee0   :  { %v1668_v7 = vpop.permute.xlu1 %1667 }
0x1ee1   :  { %2525 = vmatmul.mubr.msk.f32.vlgmr.msra.gmra.mrb[22].mxu1 %vm259_vm3, %v1668_v7 }
0x1ee2   :  { %2697 = vmatpush3.bf16.msra.mxu1 %v3154_v26  ;;  %2546 = vmatprep.mubr.msk.f32.mxu1 %vm2876_vm0, %v2877_v20 }
0x1ee3   :  { %2698 = vmatprep.subr.bf16.mxu1 %v2875_v1 }
0x1ee6   :  { %2700 = vmatpush3.bf16.msra.mxu1 %v3164_v29 }
0x1ee7   :  { %2707 = vmatprep.subr.bf16.mxu1 %v2875_v1 }
0x1fb4   :  { %v1737_v12 = vpop.f32.mrb[22].mxu1 }
0x1fb5   :  { %v1741_v13 = vadd.f32 %v1737_v12, %v1240_v11  ;;  %v2526_v14 = vpop.f32.mrb[23].mxu1 }
0x1fb7   :  { %2798 = vtanh.f32 %v1741_v13  ;;  %v1742_v17 = vmul.f32 0.5, %v1741_v13 }
0x1fb9   :  { %2800 = vtanh.f32 %v1742_v17 }
0x1fc1   :  { %v2799_v16 = vpop.eup %2798 }
0x1fc2   :  { %1749 = vrot.lane.b32.xlu0 %v2799_v16, %s2879_s25 }
0x1fc3   :  { %v2801_v18 = vpop.eup %2800 }
0x1fc4   :  { %v1744_v19 = vmul.f32 0.5, %v2801_v18 }
0x1fc6   :  { %v1745_v4 = vadd.f32 0.5, %v1744_v19  ;;  %v2066_v19 = vld [vmem:[#allocation7 + $0x10] sm:$0xff] }
0x1fc8   :  { %v1747_v24 = vmul.f32 %v1745_v4, %v1657_v2 }
0x2034   :  { %v1750_v22 = vpop.permute.xlu0 %1749 }
0x2035   :  { %v1752_v23 = vmul.f32 %v1750_v22, %v1745_v4  ;;  %v2067_v22 = vld [vmem:[#allocation7 + $0x18] sm:$0xff] }
0x2037   :  { %1754 = vrot.lane.b32.xlu1 %v1752_v23, %s2880_s26  ;;  %v2711_v23 = vpack.c.bf16 %v2067_v22, %v2066_v19 }
0x20a9   :  { %v1755_v25 = vpop.permute.xlu1 %1754 }
0x20aa   :  { %v1757_v27 = vadd.f32 %v1755_v25, %v1747_v24 }
0x20ac   :  { %2802 = vtanh.f32 %v1757_v27 }
0x20b6   :  { %v2803_v10 = vpop.eup %2802 }
0x20b7   :  { %1760 = vrot.lane.b32.xlu0 %v2803_v10, %s2879_s25 }
0x2129   :  { %v1761_v28 = vpop.permute.xlu0 %1760 }
0x212a   :  { %v1763_v31 = vmul.f32 %v1761_v28, %v1745_v4  ;;  %v2708_v4 = vpack.c.bf16 %v2065_v30, %v2064_v15  ;;  %v2197_v28 = vld [vmem:[%s3306_s8] ss:$0 sm:$0xff] }
0x212c   :  { %1767 = vrot.lane.b32.xlu1 %v1763_v31, %s2880_s26 }
0x219e   :  { %v1768_v32 = vpop.permute.xlu1 %1767 }
0x219f   :  { %2536 = vmatmul.mubr.msk.f32.vlgmr.msra.gmra.mrb[18].mxu0 %vm259_vm3, %v1768_v32 }
0x21a0   :  { %2703 = vmatpush3.bf16.msra.mxu0 %v3154_v26  ;;  %2557 = vmatprep.mubr.msk.f32.mxu0 %vm2876_vm0, %v2877_v20 }
0x21a1   :  { %2704 = vmatprep.subr.bf16.mxu0 %v2875_v1 }
0x21a4   :  { %2706 = vmatpush3.bf16.msra.mxu0 %v3164_v29 }
0x2272   :  { %v1837_v34 = vpop.f32.mrb[18].mxu0 }
0x2273   :  { %v1841_v35 = vadd.f32 %v1837_v34, %v1245_v33  ;;  %v2537_v37 = vpop.f32.mrb[19].mxu0 }
0x2275   :  { %2804 = vtanh.f32 %v1841_v35  ;;  %v1842_v40 = vmul.f32 0.5, %v1841_v35 }
0x2277   :  { %2806 = vtanh.f32 %v1842_v40 }
0x227f   :  { %v2805_v39 = vpop.eup %2804 }
0x2280   :  { %1849 = vrot.lane.b32.xlu0 %v2805_v39, %s2879_s25 }
0x2281   :  { %v2807_v26 = vpop.eup %2806 }
0x2282   :  { %v1844_v41 = vmul.f32 0.5, %v2807_v26 }
0x2284   :  { %v1845_v21 = vadd.f32 0.5, %v1844_v41 }
0x2286   :  { %v1847_v29 = vmul.f32 %v1845_v21, %v1757_v27 }
0x22f2   :  { %v1850_v43 = vpop.permute.xlu0 %1849 }
0x22f3   :  { %v1852_v44 = vmul.f32 %v1850_v43, %v1845_v21 }
0x22f5   :  { %1854 = vrot.lane.b32.xlu1 %v1852_v44, %s2880_s26 }
0x2367   :  { %v1855_v42 = vpop.permute.xlu1 %1854 }
0x2368   :  { %v1857_v36 = vadd.f32 %v1855_v42, %v1847_v29 }
0x236a   :  { %2808 = vtanh.f32 %v1857_v36 }
0x2374   :  { %v2809_v9 = vpop.eup %2808 }
0x2375   :  { %1860 = vrot.lane.b32.xlu0 %v2809_v9, %s2879_s25 }
0x23e7   :  { %v1861_v45 = vpop.permute.xlu0 %1860 }
0x23e8   :  { %v1863_v46 = vmul.f32 %v1861_v45, %v1845_v21 }
0x23ea   :  { %1867 = vrot.lane.b32.xlu1 %v1863_v46, %s2880_s26 }
0x245c   :  { %v1868_v47 = vpop.permute.xlu1 %1867 }
0x245d   :  { %2547 = vmatmul.mubr.msk.f32.vlgmr.msra.gmra.mrb[24].mxu1 %vm259_vm3, %v1868_v47 }
0x245e   :  { %2568 = vmatprep.mubr.msk.f32.mxu1 %vm2876_vm0, %v2877_v20  ;;  %2709 = vmatpush3.bf16.msra.mxu1 %v2708_v4 }
0x245f   :  { %2710 = vmatprep.subr.bf16.mxu1 %v2875_v1 }
0x2462   :  { %2712 = vmatpush3.bf16.msra.mxu1 %v2711_v23 }
0x2530   :  { %v1937_v8 = vpop.f32.mrb[24].mxu1 }
0x2531   :  { %v1941_v49 = vadd.f32 %v1937_v8, %v1250_v48  ;;  %v2548_v50 = vpop.f32.mrb[25].mxu1 }
0x2533   :  { %2810 = vtanh.f32 %v1941_v49  ;;  %v1942_v52 = vmul.f32 0.5, %v1941_v49 }
0x2535   :  { %2812 = vtanh.f32 %v1942_v52 }
0x253d   :  { %v2811_v51 = vpop.eup %2810 }
0x253e   :  { %1949 = vrot.lane.b32.xlu0 %v2811_v51, %s2879_s25 }
0x253f   :  { %v2813_v53 = vpop.eup %2812 }
0x2540   :  { %v1944_v54 = vmul.f32 0.5, %v2813_v53 }
0x2542   :  { %v1945_v55 = vadd.f32 0.5, %v1944_v54 }
0x2544   :  { %v1947_v20 = vmul.f32 %v1945_v55, %v1857_v36 }
0x25b0   :  { %v1950_v56 = vpop.permute.xlu0 %1949 }
0x25b1   :  { %v1952_v57 = vmul.f32 %v1950_v56, %v1945_v55 }
0x25b3   :  { %1954 = vrot.lane.b32.xlu1 %v1952_v57, %s2880_s26 }
0x2625   :  { %v1955_v58 = vpop.permute.xlu1 %1954 }
0x2626   :  { %v1957_v59 = vadd.f32 %v1955_v58, %v1947_v20 }
0x2628   :  { %2814 = vtanh.f32 %v1957_v59 }
0x2632   :  { %v2815_v38 = vpop.eup %2814 }
0x2633   :  { %1960 = vrot.lane.b32.xlu0 %v2815_v38, %s2879_s25 }
0x26a5   :  { %v1961_v60 = vpop.permute.xlu0 %1960 }
0x26a6   :  { %v1963_v61 = vmul.f32 %v1961_v60, %v1945_v55 }
0x26a8   :  { %1967 = vrot.lane.b32.xlu1 %v1963_v61, %s2880_s26 }
0x271a   :  { %v1968_v62 = vpop.permute.xlu1 %1967 }
0x271b   :  { %2558 = vmatmul.mubr.msk.f32.vlgmr.msra.gmra.mrb[20].mxu0 %vm259_vm3, %v1968_v62 }
0x27ee   :  { %v2037_v0 = vpop.f32.mrb[20].mxu0 }
0x27ef   :  { %v2041_v2 = vadd.f32 %v2037_v0, %v1255_v63  ;;  %v2559_v6 = vpop.f32.mrb[21].mxu0 }
0x27f1   :  { %2816 = vtanh.f32 %v2041_v2  ;;  %v2042_v5 = vmul.f32 0.5, %v2041_v2 }
0x27f3   :  { %2818 = vtanh.f32 %v2042_v5 }
0x27fb   :  { %v2817_v3 = vpop.eup %2816 }
0x27fc   :  { %2049 = vrot.lane.b32.xlu0 %v2817_v3, %s2879_s25 }
0x27fd   :  { %v2819_v7 = vpop.eup %2818 }
0x27fe   :  { %v2044_v11 = vmul.f32 0.5, %v2819_v7 }
0x2800   :  { %v2045_v12 = vadd.f32 0.5, %v2044_v11 }
0x2802   :  { %v2047_v16 = vmul.f32 %v2045_v12, %v1957_v59 }
0x286e   :  { %v2050_v13 = vpop.permute.xlu0 %2049 }
0x286f   :  { %v2052_v14 = vmul.f32 %v2050_v13, %v2045_v12 }
0x2871   :  { %2054 = vrot.lane.b32.xlu1 %v2052_v14, %s2880_s26 }
0x28e3   :  { %v2055_v17 = vpop.permute.xlu1 %2054 }
0x28e4   :  { %v2057_v18 = vadd.f32 %v2055_v17, %v2047_v16 }
0x28e6   :  { %2820 = vtanh.f32 %v2057_v18 }
0x28f0   :  { %v2821_v24 = vpop.eup %2820 }
0x28f1   :  { %2060 = vrot.lane.b32.xlu0 %v2821_v24, %s2879_s25 }
0x2963   :  { %v2061_v25 = vpop.permute.xlu0 %2060 }
0x2964   :  { %v2063_v27 = vmul.f32 %v2061_v25, %v2045_v12 }
0x2966   :  { %2076 = vrot.lane.b32.xlu1 %v2063_v27, %s2880_s26 }
0x29d8   :  { %v2077_v10 = vpop.permute.xlu1 %2076 }
0x29d9   :  { %2569 = vmatmul.mubr.msk.f32.vlgmr.msra.gmra.mrb[26].mxu1 %vm259_vm3, %v2077_v10 }
0x2aac   :  { %v2146_v31 = vpop.f32.mrb[26].mxu1 }
0x2aad   :  { %v2147_v32 = vadd.f32 %v2197_v28, %v2146_v31  ;;  %v2570_v33 = vpop.f32.mrb[27].mxu1 }
0x2aaf   :  { %2150 = vst [vmem:[%s3307_s9] sm:$0xff] %v2147_v32 }
0x2ab0   :  { %2155 = vsyncpa [#allocation6], 1 }
0x2ab1   :  { %2156 = vsyncpa [#allocation8], 1 }

</bundles_post_ra>
